<compile_context>
chip_gen: v7x
topology: tpu7x:2x2x1
jax: 0.10.0
libtpu: 0.0.40
codegen_flags: <defaults>
</compile_context>

<pallas_src>
import functools

import jax
import jax.numpy as jnp
from jax import lax
from jax.experimental import pallas as pl
from jax.experimental.pallas import tpu as pltpu

VMEM = pltpu.MemorySpace.VMEM


# ----------------------------------------------------------------------------
# Per-generation constants
# ----------------------------------------------------------------------------
def _device_kind():
    try:
        return jax.devices()[0].device_kind.lower()
    except Exception:  # pragma: no cover - defensive
        return ""


_KIND = _device_kind()
_N_TILE = 128 if "v5" in _KIND else 256              # v5e MXU is 128 wide
_VMEM_LIMIT = (64 if "v6" in _KIND else 32) * 1024 * 1024   # v7x: 64MiB physical
_M_TILE = 512                                        # stem matmul row tile


def _round_up(x, m):
    return (x + m - 1) // m * m


def _cout_tile(c):
    return min(c, _N_TILE)


# ----------------------------------------------------------------------------
# Padded-flat activation layout
#   valid pixel (h, w) of an (H, W, C) feature map lives at flat index
#   (1 + h) * WP + (1 + w); every other position is zero.
# ----------------------------------------------------------------------------
def _layout(H, W):
    WP = W + 2 + (W % 2)          # even, >= W + 2
    HP = H + 3
    HP += HP % 2                  # even, >= H + 3
    return HP, WP


def to_padded_flat(x):
    N, H, W, C = x.shape
    HP, WP = _layout(H, W)
    xp = jnp.pad(x, ((0, 0), (1, HP - 1 - H), (1, WP - 1 - W), (0, 0)))
    return xp.reshape(N, HP * WP, C)


def from_padded_flat(x_flat, H, W):
    N, _, C = x_flat.shape
    HP, WP = _layout(H, W)
    return x_flat.reshape(N, HP, WP, C)[:, 1:1 + H, 1:1 + W, :]


# ----------------------------------------------------------------------------
# Generic tiled matmul + bias (+ReLU) kernel  (stem conv after im2col)
# ----------------------------------------------------------------------------
def _matmul_bias_kernel(x_ref, w_ref, b_ref, o_ref, *, relu):
    acc = jnp.dot(x_ref[...], w_ref[...], preferred_element_type=jnp.float32)
    acc = acc + b_ref[...]
    if relu:
        acc = jnp.maximum(acc, 0.0)
    o_ref[...] = acc.astype(o_ref.dtype)


def pallas_matmul_bias(x, w, b, relu, out_dtype=jnp.bfloat16):
    M, K = x.shape
    _, Nc = w.shape
    TM = min(_M_TILE, _round_up(M, 8))
    Mp = _round_up(M, TM)
    if Mp != M:
        x = jnp.pad(x, ((0, Mp - M), (0, 0)))
    TN = _cout_tile(Nc)
    out = pl.pallas_call(
        functools.partial(_matmul_bias_kernel, relu=relu),
        out_shape=jax.ShapeDtypeStruct((Mp, Nc), out_dtype),
        grid=(Mp // TM, Nc // TN),
        in_specs=[
            pl.BlockSpec((TM, K), lambda i, j: (i, 0)),
            pl.BlockSpec((K, TN), lambda i, j: (0, j)),
            pl.BlockSpec((1, TN), lambda i, j: (0, j)),
        ],
        out_specs=pl.BlockSpec((TM, TN), lambda i, j: (i, j)),
        compiler_params=pltpu.CompilerParams(
            dimension_semantics=("parallel", "parallel"),
            vmem_limit_bytes=_VMEM_LIMIT),
    )(x, w, b)
    return out[:M] if Mp != M else out


# ----------------------------------------------------------------------------
# Stride-1 3x3 conv (padded-flat in -> padded-flat out), fused bias/res/ReLU
# ----------------------------------------------------------------------------
def _conv_s1_kernel(x_ref, w_ref, b_ref, *rest, M, WP, W, relu, has_res):
    if has_res:
        r_ref, o_ref = rest
    else:
        (o_ref,) = rest

    acc = None
    for di in range(3):
        for dj in range(3):
            lhs = x_ref[0, pl.ds(di * WP + dj, M), :]          # contiguous slice
            part = jnp.dot(lhs, w_ref[di * 3 + dj],
                           preferred_element_type=jnp.float32)
            acc = part if acc is None else acc + part
    acc = acc + b_ref[...]
    if has_res:
        acc = acc + r_ref[0, pl.ds(WP + 1, M), :].astype(jnp.float32)
    if relu:
        acc = jnp.maximum(acc, 0.0)

    # Re-zero the pad columns so the output is a valid padded-flat tensor.
    col = (lax.broadcasted_iota(jnp.int32, acc.shape, 0) + 1) % WP
    acc = jnp.where((col >= 1) & (col <= W), acc, 0.0)

    TN = o_ref.shape[-1]
    LP = o_ref.shape[1]
    tail = LP - (WP + 1) - M
    o_ref[0, pl.ds(0, WP + 1), :] = jnp.zeros((WP + 1, TN), o_ref.dtype)
    o_ref[0, pl.ds(WP + 1, M), :] = acc.astype(o_ref.dtype)
    o_ref[0, pl.ds(WP + 1 + M, tail), :] = jnp.zeros((tail, TN), o_ref.dtype)


def conv3x3_s1(x_flat, H, W, p, relu, residual=None):
    N, LP, Cin = x_flat.shape
    Cout = p["w"].shape[-1]
    HP, WP = _layout(H, W)
    assert LP == HP * WP
    M = H * WP
    TN = _cout_tile(Cout)
    nj = Cout // TN
    has_res = residual is not None
    weight_stationary = 9 * Cin * Cout >= LP * Cin    # layer3/4: weights resident

    if weight_stationary:
        grid = (nj, N)
        xm = lambda j, n: (n, 0, 0)
        wm = lambda j, n: (0, 0, j)
        bm = lambda j, n: (0, j)
        om = lambda j, n: (n, 0, j)
    else:
        grid = (N, nj)
        xm = lambda n, j: (n, 0, 0)
        wm = lambda n, j: (0, 0, j)
        bm = lambda n, j: (0, j)
        om = lambda n, j: (n, 0, j)

    in_specs = [
        pl.BlockSpec((1, LP, Cin), xm),
        pl.BlockSpec((9, Cin, TN), wm),
        pl.BlockSpec((1, TN), bm),
    ]
    inputs = [x_flat, p["w"], p["b"]]
    if has_res:
        in_specs.append(pl.BlockSpec((1, LP, TN), om))
        inputs.append(residual)

    return pl.pallas_call(
        functools.partial(_conv_s1_kernel, M=M, WP=WP, W=W, relu=relu,
                          has_res=has_res),
        out_shape=jax.ShapeDtypeStruct((N, LP, Cout), jnp.bfloat16),
        grid=grid,
        in_specs=in_specs,
        out_specs=pl.BlockSpec((1, LP, TN), om),
        compiler_params=pltpu.CompilerParams(
            dimension_semantics=("parallel", "parallel"),
            vmem_limit_bytes=_VMEM_LIMIT),
    )(*inputs)


# ----------------------------------------------------------------------------
# Stride-2 3x3 conv fused with the 1x1 stride-2 downsample (two outputs)
# Input is the padded-flat tensor viewed as (N, HP/2, 2, WP/2, 2*Cin):
# all 9 taps become 6 unit-stride tap matmuls with merged (2*Cin) weights.
# ----------------------------------------------------------------------------
def _conv_s2_ds_kernel(x_ref, w1_ref, b1_ref, wd_ref, bd_ref, o1_ref, od_ref,
                       *, Ho, Wo):
    C2 = x_ref.shape[-1]                              # 2 * Cin
    r0 = x_ref[0, pl.ds(0, Ho), :, :, :]              # row pairs ho .. ho+Ho
    r1 = x_ref[0, pl.ds(1, Ho), :, :, :]
    planes = (r0[:, 0], r0[:, 1], r1[:, 0])           # input rows 2*ho + di

    acc = None
    ds_lhs = None
    for di in range(3):
        for po in range(2):
            lhs = planes[di][:, po:po + Wo, :].reshape(Ho * Wo, C2)
            if di == 1 and po == 0:
                ds_lhs = lhs                          # also the 1x1/s2 input
            part = jnp.dot(lhs, w1_ref[di * 2 + po],
                           preferred_element_type=jnp.float32)
            acc = part if acc is None else acc + part
    acc = jnp.maximum(acc + b1_ref[...], 0.0)
    accd = jnp.dot(ds_lhs, wd_ref[...], preferred_element_type=jnp.float32)
    accd = accd + bd_ref[...]

    TN = o1_ref.shape[-1]
    o1_ref[...] = jnp.zeros(o1_ref.shape, o1_ref.dtype)
    od_ref[...] = jnp.zeros(od_ref.shape, od_ref.dtype)
    o1_ref[0, pl.ds(1, Ho), pl.ds(1, Wo), :] = (
        acc.reshape(Ho, Wo, TN).astype(o1_ref.dtype))
    od_ref[0, pl.ds(1, Ho), pl.ds(1, Wo), :] = (
        accd.reshape(Ho, Wo, TN).astype(od_ref.dtype))


def conv3x3_s2_downsample(x_flat, H, W, p, pds):
    N, LP, Cin = x_flat.shape
    Cout = p["w"].shape[-1]
    HP, WP = _layout(H, W)
    assert LP == HP * WP
    Ho = (H - 1) // 2 + 1
    Wo = (W - 1) // 2 + 1
    HPo, WPo = _layout(Ho, Wo)
    x5 = x_flat.reshape(N, HP // 2, 2, WP // 2, 2 * Cin)   # free reshape
    TN = _cout_tile(Cout)
    nj = Cout // TN
    weight_stationary = 12 * Cin * Cout >= LP * Cin

    if weight_stationary:
        grid = (nj, N)
        xm = lambda j, n: (n, 0, 0, 0, 0)
        w1m = lambda j, n: (0, 0, j)
        bm = lambda j, n: (0, j)
        wdm = lambda j, n: (0, j)
        om = lambda j, n: (n, 0, 0, j)
    else:
        grid = (N, nj)
        xm = lambda n, j: (n, 0, 0, 0, 0)
        w1m = lambda n, j: (0, 0, j)
        bm = lambda n, j: (0, j)
        wdm = lambda n, j: (0, j)
        om = lambda n, j: (n, 0, 0, j)

    out_shape = (jax.ShapeDtypeStruct((N, HPo, WPo, Cout), jnp.bfloat16),
                 jax.ShapeDtypeStruct((N, HPo, WPo, Cout), jnp.bfloat16))
    out1, outd = pl.pallas_call(
        functools.partial(_conv_s2_ds_kernel, Ho=Ho, Wo=Wo),
        out_shape=out_shape,
        grid=grid,
        in_specs=[
            pl.BlockSpec((1, HP // 2, 2, WP // 2, 2 * Cin), xm),
            pl.BlockSpec((6, 2 * Cin, TN), w1m),
            pl.BlockSpec((1, TN), bm),
            pl.BlockSpec((2 * Cin, TN), wdm),
            pl.BlockSpec((1, TN), bm),
        ],
        out_specs=(pl.BlockSpec((1, HPo, WPo, TN), om),
                   pl.BlockSpec((1, HPo, WPo, TN), om)),
        compiler_params=pltpu.CompilerParams(
            dimension_semantics=("parallel", "parallel"),
            vmem_limit_bytes=_VMEM_LIMIT),
    )(x5, p["w"], p["b"], pds["w"], pds["b"])
    return (out1.reshape(N, HPo * WPo, Cout),
            outd.reshape(N, HPo * WPo, Cout), Ho, Wo)


# ----------------------------------------------------------------------------
# 3x3 / stride-2 / pad-1 max pool of a non-negative tensor (lane-paired view)
# ----------------------------------------------------------------------------
def _maxpool_kernel(x_ref, o_ref, *, Ho, Wo):
    x = x_ref[0, :, :, :]                  # (HPm, WPm/2, 2*C)
    C = x.shape[-1] // 2
    lo = x[:, :, :C]                       # even columns
    hi = x[:, :, C:]                       # odd columns
    # width-direction max for output column wo: cols {2wo, 2wo+1, 2wo+2}
    m1 = jnp.maximum(jnp.maximum(lo[:, :Wo, :], hi[:, :Wo, :]),
                     lo[:, 1:Wo + 1, :])   # (HPm, Wo, C)
    m1 = m1.reshape(m1.shape[0] // 2, 2, Wo, C)
    a0 = m1[:, 0]                          # even rows
    a1 = m1[:, 1]                          # odd rows
    out = jnp.maximum(jnp.maximum(a0[:Ho], a1[:Ho]), a0[1:Ho + 1])
    o_ref[0, :, :, :] = out.astype(o_ref.dtype)


def maxpool_3x3_s2(x):
    N, H, W, C = x.shape
    Ho = (H - 1) // 2 + 1
    Wo = (W - 1) // 2 + 1
    HPm = 2 * Ho + 2
    WPm = 2 * Wo + 2
    xp = jnp.pad(x, ((0, 0), (1, HPm - 1 - H), (1, WPm - 1 - W), (0, 0)))
    xq = xp.reshape(N, HPm, WPm // 2, 2 * C)     # free lane-pairing reshape
    return pl.pallas_call(
        functools.partial(_maxpool_kernel, Ho=Ho, Wo=Wo),
        out_shape=jax.ShapeDtypeStruct((N, Ho, Wo, C), x.dtype),
        grid=(N,),
        in_specs=[pl.BlockSpec((1, HPm, WPm // 2, 2 * C),
                               lambda n: (n, 0, 0, 0))],
        out_specs=pl.BlockSpec((1, Ho, Wo, C), lambda n: (n, 0, 0, 0)),
        compiler_params=pltpu.CompilerParams(
            dimension_semantics=("parallel",),
            vmem_limit_bytes=_VMEM_LIMIT),
    )(xq)


# ----------------------------------------------------------------------------
# Fused global average pool + FC (pads are zero, so summing all rows is exact)
# ----------------------------------------------------------------------------
def _pool_fc_kernel(x_ref, w_ref, b_ref, o_ref, *, inv_count):
    pooled = jnp.sum(x_ref[...].astype(jnp.float32), axis=1) * inv_count
    acc = jnp.dot(pooled.astype(jnp.bfloat16), w_ref[...],
                  preferred_element_type=jnp.float32)
    o_ref[...] = acc + b_ref[...]


def pallas_pool_fc(x_flat, hw_count, w, b):
    N = x_flat.shape[0]
    Np = w.shape[1]
    return pl.pallas_call(
        functools.partial(_pool_fc_kernel, inv_count=1.0 / float(hw_count)),
        out_shape=jax.ShapeDtypeStruct((N, Np), jnp.float32),
        in_specs=[pl.BlockSpec(memory_space=VMEM)] * 3,
        out_specs=pl.BlockSpec(memory_space=VMEM),
        compiler_params=pltpu.CompilerParams(vmem_limit_bytes=_VMEM_LIMIT),
    )(x_flat, w, b)


# ----------------------------------------------------------------------------
# Stem: 7x7/stride-2/pad-3 conv via XLA im2col + matmul kernel (K = 147)
# ----------------------------------------------------------------------------
def im2col_7x7_s2(x):
    N, H, W, C = x.shape
    xp = jnp.pad(x, ((0, 0), (3, 3), (3, 3), (0, 0)))
    Ho = (H - 1) // 2 + 1
    Wo = (W - 1) // 2 + 1
    cols = []
    for i in range(7):
        for j in range(7):
            cols.append(xp[:, i:i + 2 * Ho:2, j:j + 2 * Wo:2, :])
    patches = jnp.stack(cols, axis=3)                 # (N, Ho, Wo, 49, C)
    return patches.reshape(N * Ho * Wo, 49 * C), Ho, Wo


def stem_conv(x, p):
    N = x.shape[0]
    cols, Ho, Wo = im2col_7x7_s2(x)
    out = pallas_matmul_bias(cols, p["w"], p["b"], relu=True)
    return out.reshape(N, Ho, Wo, p["w"].shape[1])


# ----------------------------------------------------------------------------
# Parameters (deterministic synthetic; BatchNorm folded into conv weights/bias)
# ----------------------------------------------------------------------------
def _fold_bn(key, shape_w, cout):
    k1, k2, k3, k4, k5 = jax.random.split(key, 5)
    w = jax.random.normal(k1, shape_w, jnp.float32) * 0.05
    gamma = 1.0 + 0.1 * jax.random.normal(k2, (cout,), jnp.float32)
    beta = 0.1 * jax.random.normal(k3, (cout,), jnp.float32)
    mean = 0.1 * jax.random.normal(k4, (cout,), jnp.float32)
    var = jax.random.uniform(k5, (cout,), jnp.float32, minval=0.5, maxval=1.5)
    scale = gamma / jnp.sqrt(var + 1e-5)              # PyTorch BN eps
    return w * scale, beta - mean * scale


def _pack_s1(w33):          # (3,3,Cin,Cout) -> (9, Cin, Cout)
    return w33.reshape(9, w33.shape[2], w33.shape[3])


def _pack_s2(w33):          # (3,3,Cin,Cout) -> (6, 2*Cin, Cout) merged taps
    cin, cout = w33.shape[2], w33.shape[3]
    zeros = jnp.zeros((cin, cout), w33.dtype)
    taps = []
    for di in range(3):
        taps.append(jnp.concatenate([w33[di, 0], w33[di, 1]], axis=0))  # po=0
        taps.append(jnp.concatenate([w33[di, 2], zeros], axis=0))       # po=1
    return jnp.stack(taps, axis=0)


def _pack_ds(w11):          # (Cin, Cout) -> (2*Cin, Cout), odd-column slot
    cin, cout = w11.shape
    return jnp.concatenate([jnp.zeros((cin, cout), w11.dtype), w11], axis=0)


def make_conv3x3_params(key, cin, cout, stride):
    w, b = _fold_bn(key, (3, 3, cin, cout), cout)
    w = w.astype(jnp.bfloat16)
    packed = _pack_s2(w) if stride == 2 else _pack_s1(w)
    return {"w": packed, "b": b.reshape(1, cout).astype(jnp.float32)}


def make_downsample_params(key, cin, cout):
    w, b = _fold_bn(key, (cin, cout), cout)
    return {"w": _pack_ds(w.astype(jnp.bfloat16)),
            "b": b.reshape(1, cout).astype(jnp.float32)}


def make_stem_params(key):
    w, b = _fold_bn(key, (7, 7, 3, 64), 64)
    return {"w": w.reshape(49 * 3, 64).astype(jnp.bfloat16),
            "b": b.reshape(1, 64).astype(jnp.float32)}


def make_block_params(key, cin, cout, stride):
    k1, k2, k3 = jax.random.split(key, 3)
    p = {"stride": stride,
         "conv1": make_conv3x3_params(k1, cin, cout, stride),
         "conv2": make_conv3x3_params(k2, cout, cout, 1)}
    if stride == 2:
        p["downsample"] = make_downsample_params(k3, cin, cout)
    return p


def make_resnet18_params(key, num_classes=10, fc_pad=128):
    keys = jax.random.split(key, 10)
    params = {"stem": make_stem_params(keys[0]), "num_classes": num_classes}
    cfg = [(64, 64, 1), (64, 128, 2), (128, 256, 2), (256, 512, 2)]
    blocks = []
    ki = 1
    for cin, cout, stride in cfg:
        blocks.append(make_block_params(keys[ki], cin, cout, stride)); ki += 1
        blocks.append(make_block_params(keys[ki], cout, cout, 1)); ki += 1
    params["blocks"] = blocks
    kw, kb = jax.random.split(keys[ki])
    fc_w = jax.random.normal(kw, (512, num_classes), jnp.float32) * 0.05
    fc_b = jax.random.normal(kb, (num_classes,), jnp.float32) * 0.05
    params["fc_w"] = jnp.pad(fc_w, ((0, 0), (0, fc_pad - num_classes))
                             ).astype(jnp.bfloat16)
    params["fc_b"] = jnp.pad(fc_b, (0, fc_pad - num_classes)
                             ).reshape(1, fc_pad).astype(jnp.float32)
    return params


# ----------------------------------------------------------------------------
# Forward pass (mirrors torchvision resnet18 forward)
# ----------------------------------------------------------------------------
def basic_block(x_flat, H, W, p):
    if p["stride"] == 1:
        c1 = conv3x3_s1(x_flat, H, W, p["conv1"], relu=True)
        out = conv3x3_s1(c1, H, W, p["conv2"], relu=True, residual=x_flat)
        return out, H, W
    c1, ident, Ho, Wo = conv3x3_s2_downsample(x_flat, H, W, p["conv1"],
                                              p["downsample"])
    out = conv3x3_s1(c1, Ho, Wo, p["conv2"], relu=True, residual=ident)
    return out, Ho, Wo


def resnet18_forward(params, x_nchw):
    x = jnp.transpose(x_nchw, (0, 2, 3, 1)).astype(jnp.bfloat16)   # NCHW->NHWC
    x = stem_conv(x, params["stem"])                  # 7x7/2 conv + BN + ReLU
    x = maxpool_3x3_s2(x)                             # 3x3/2 max pool
    N, H, W, _ = x.shape
    xf = to_padded_flat(x)                            # persistent padded layout
    for blk in params["blocks"]:
        xf, H, W = basic_block(xf, H, W, blk)
    logits = pallas_pool_fc(xf, H * W, params["fc_w"], params["fc_b"])
    return logits[:, :params["num_classes"]]


# ----------------------------------------------------------------------------
# XLA references for kernel unit checks
# ----------------------------------------------------------------------------
def _ref_conv3x3(x, w, b, stride, relu, residual=None):
    out = lax.conv_general_dilated(
        x.astype(jnp.float32), w.astype(jnp.float32),
        window_strides=(stride, stride), padding=((1, 1), (1, 1)),
        dimension_numbers=("NHWC", "HWIO", "NHWC"))
    out = out + b.reshape(1, 1, 1, -1)
    if residual is not None:
        out = out + residual.astype(jnp.float32)
    if relu:
        out = jnp.maximum(out, 0.0)
    return out


def _run_unit_checks():
    ks = jax.random.split(jax.random.PRNGKey(1), 8)
    Nb, H, W, Cin = 2, 8, 8, 64

    # -- stride-1 conv with residual + ReLU --
    xc = jax.random.normal(ks[0], (Nb, H, W, Cin), jnp.float32).astype(jnp.bfloat16)
    wc = (jax.random.normal(ks[1], (3, 3, Cin, Cin), jnp.float32) * 0.05
          ).astype(jnp.bfloat16)
    bc = jax.random.normal(ks[2], (Cin,), jnp.float32) * 0.1
    rc = jax.random.normal(ks[3], (Nb, H, W, Cin), jnp.float32).astype(jnp.bfloat16)
    p1 = {"w": _pack_s1(wc), "b": bc.reshape(1, Cin)}
    got = conv3x3_s1(to_padded_flat(xc), H, W, p1, relu=True,
                     residual=to_padded_flat(rc))
    got = from_padded_flat(got, H, W).astype(jnp.float32)
    want = _ref_conv3x3(xc, wc, bc, 1, True, rc)
    assert jnp.allclose(got, want, atol=0.08, rtol=0.08), "conv s1 mismatch"

    # -- stride-2 conv fused with 1x1 downsample --
    Cout = 128
    wc2 = (jax.random.normal(ks[4], (3, 3, Cin, Cout), jnp.float32) * 0.05
           ).astype(jnp.bfloat16)
    bc2 = jax.random.normal(ks[5], (Cout,), jnp.float32) * 0.1
    wdd = (jax.random.normal(ks[6], (Cin, Cout), jnp.float32) * 0.05
           ).astype(jnp.bfloat16)
    bdd = jax.random.normal(ks[7], (Cout,), jnp.float32) * 0.1
    p2 = {"w": _pack_s2(wc2), "b": bc2.reshape(1, Cout)}
    pd = {"w": _pack_ds(wdd), "b": bdd.reshape(1, Cout)}
    o1, od, Ho, Wo = conv3x3_s2_downsample(to_padded_flat(xc), H, W, p2, pd)
    o1 = from_padded_flat(o1, Ho, Wo).astype(jnp.float32)
    od = from_padded_flat(od, Ho, Wo).astype(jnp.float32)
    want1 = _ref_conv3x3(xc, wc2, bc2, 2, True)
    wantd = lax.conv_general_dilated(
        xc.astype(jnp.float32), wdd.astype(jnp.float32)[None, None],
        (2, 2), "VALID", dimension_numbers=("NHWC", "HWIO", "NHWC"))
    wantd = wantd + bdd.reshape(1, 1, 1, -1)
    assert jnp.allclose(o1, want1, atol=0.08, rtol=0.08), "conv s2 mismatch"
    assert jnp.allclose(od, wantd, atol=0.08, rtol=0.08), "downsample mismatch"

    # -- max pool --
    xm = jnp.maximum(jax.random.normal(ks[0], (Nb, 16, 16, 64), jnp.float32), 0.0
                     ).astype(jnp.bfloat16)
    gotm = maxpool_3x3_s2(xm).astype(jnp.float32)
    wantm = lax.reduce_window(xm.astype(jnp.float32), -jnp.inf, lax.max,
                              (1, 3, 3, 1), (1, 2, 2, 1),
                              ((0, 0), (1, 1), (1, 1), (0, 0)))
    assert jnp.allclose(gotm, wantm, atol=1e-2), "maxpool mismatch"


if __name__ == "__main__":
    key = jax.random.PRNGKey(0)
    kx, kp = jax.random.split(key)

    _run_unit_checks()                       # Pallas kernels vs XLA references

    # Small NCHW input; the ResNet18 stem needs 3 channels, >=32 spatial.
    x = jax.random.normal(kx, (2, 3, 32, 32), jnp.float32)
    params = make_resnet18_params(kp, num_classes=10)

    fwd = jax.jit(functools.partial(resnet18_forward, params))
    logits = fwd(x)
    jax.block_until_ready(logits)
    assert logits.shape == (2, 10) and logits.dtype == jnp.float32
    assert bool(jnp.all(jnp.isfinite(logits)))
    print("KERNEL_OK")
</pallas_src>

<mosaic_0001>
module attributes {stable_mosaic.version = 11 : i64} {
  func.func @_conv_s1_kernel(%arg0: i32, %arg1: i32, %arg2: memref<1x120x64xbf16, #tpu.memory_space<vmem>>, %arg3: memref<9x64x64xbf16, #tpu.memory_space<vmem>>, %arg4: memref<1x64xf32, #tpu.memory_space<vmem>>, %arg5: memref<1x120x64xbf16, #tpu.memory_space<vmem>>, %arg6: memref<1x120x64xbf16, #tpu.memory_space<vmem>>) attributes {dimension_semantics = [#tpu.dimension_semantics<parallel>, #tpu.dimension_semantics<parallel>], iteration_bounds = array<i64: 1, 2>, scalar_prefetch = 0 : i64, scratch_operands = 0 : i64, tpu.core_type = #tpu.core_type<tc>, window_params = [{transform_indices = @transform_0, window_bounds = array<i64: 1, 120, 64>}, {transform_indices = @transform_1, window_bounds = array<i64: 9, 64, 64>}, {transform_indices = @transform_2, window_bounds = array<i64: 1, 64>}, {transform_indices = @transform_3, window_bounds = array<i64: 1, 120, 64>}, {transform_indices = @transform_4, window_bounds = array<i64: 1, 120, 64>}]} {
    %c0 = arith.constant 0 : index
    %c0_0 = arith.constant 0 : index
    %c0_1 = arith.constant 0 : index
    %0 = vector.load %arg2[%c0, %c0_0, %c0_1] : memref<1x120x64xbf16, #tpu.memory_space<vmem>>, vector<1x80x64xbf16>
    %1 = vector.shape_cast %0 : vector<1x80x64xbf16> to vector<80x64xbf16>
    %c0_2 = arith.constant 0 : index
    %c0_3 = arith.constant 0 : index
    %c0_4 = arith.constant 0 : index
    %2 = vector.load %arg3[%c0_2, %c0_3, %c0_4] : memref<9x64x64xbf16, #tpu.memory_space<vmem>>, vector<1x64x64xbf16>
    %3 = vector.shape_cast %2 : vector<1x64x64xbf16> to vector<64x64xbf16>
    %cst = arith.constant dense<0.000000e+00> : vector<80x64xf32>
    %4 = tpu.matmul %1, %3, %cst {dimension_numbers = #tpu.dot_dimension_numbers<[1], [0], [0], [1], [0, 0, 1, 1], [], []>} : vector<80x64xbf16>, vector<64x64xbf16>, vector<80x64xf32> -> vector<80x64xf32>
    %c0_5 = arith.constant 0 : index
    %c1 = arith.constant 1 : index
    %c0_6 = arith.constant 0 : index
    %5 = vector.load %arg2[%c0_5, %c1, %c0_6] : memref<1x120x64xbf16, #tpu.memory_space<vmem>>, vector<1x80x64xbf16>
    %6 = vector.shape_cast %5 : vector<1x80x64xbf16> to vector<80x64xbf16>
    %c1_7 = arith.constant 1 : index
    %c0_8 = arith.constant 0 : index
    %c0_9 = arith.constant 0 : index
    %7 = vector.load %arg3[%c1_7, %c0_8, %c0_9] : memref<9x64x64xbf16, #tpu.memory_space<vmem>>, vector<1x64x64xbf16>
    %8 = vector.shape_cast %7 : vector<1x64x64xbf16> to vector<64x64xbf16>
    %cst_10 = arith.constant dense<0.000000e+00> : vector<80x64xf32>
    %9 = tpu.matmul %6, %8, %cst_10 {dimension_numbers = #tpu.dot_dimension_numbers<[1], [0], [0], [1], [0, 0, 1, 1], [], []>} : vector<80x64xbf16>, vector<64x64xbf16>, vector<80x64xf32> -> vector<80x64xf32>
    %10 = arith.addf %4, %9 : vector<80x64xf32>
    %c0_11 = arith.constant 0 : index
    %c2 = arith.constant 2 : index
    %c0_12 = arith.constant 0 : index
    %11 = vector.load %arg2[%c0_11, %c2, %c0_12] : memref<1x120x64xbf16, #tpu.memory_space<vmem>>, vector<1x80x64xbf16>
    %12 = vector.shape_cast %11 : vector<1x80x64xbf16> to vector<80x64xbf16>
    %c2_13 = arith.constant 2 : index
    %c0_14 = arith.constant 0 : index
    %c0_15 = arith.constant 0 : index
    %13 = vector.load %arg3[%c2_13, %c0_14, %c0_15] : memref<9x64x64xbf16, #tpu.memory_space<vmem>>, vector<1x64x64xbf16>
    %14 = vector.shape_cast %13 : vector<1x64x64xbf16> to vector<64x64xbf16>
    %cst_16 = arith.constant dense<0.000000e+00> : vector<80x64xf32>
    %15 = tpu.matmul %12, %14, %cst_16 {dimension_numbers = #tpu.dot_dimension_numbers<[1], [0], [0], [1], [0, 0, 1, 1], [], []>} : vector<80x64xbf16>, vector<64x64xbf16>, vector<80x64xf32> -> vector<80x64xf32>
    %16 = arith.addf %10, %15 : vector<80x64xf32>
    %c0_17 = arith.constant 0 : index
    %c10 = arith.constant 10 : index
    %c0_18 = arith.constant 0 : index
    %17 = vector.load %arg2[%c0_17, %c10, %c0_18] : memref<1x120x64xbf16, #tpu.memory_space<vmem>>, vector<1x80x64xbf16>
    %18 = vector.shape_cast %17 : vector<1x80x64xbf16> to vector<80x64xbf16>
    %c3 = arith.constant 3 : index
    %c0_19 = arith.constant 0 : index
    %c0_20 = arith.constant 0 : index
    %19 = vector.load %arg3[%c3, %c0_19, %c0_20] : memref<9x64x64xbf16, #tpu.memory_space<vmem>>, vector<1x64x64xbf16>
    %20 = vector.shape_cast %19 : vector<1x64x64xbf16> to vector<64x64xbf16>
    %cst_21 = arith.constant dense<0.000000e+00> : vector<80x64xf32>
    %21 = tpu.matmul %18, %20, %cst_21 {dimension_numbers = #tpu.dot_dimension_numbers<[1], [0], [0], [1], [0, 0, 1, 1], [], []>} : vector<80x64xbf16>, vector<64x64xbf16>, vector<80x64xf32> -> vector<80x64xf32>
    %22 = arith.addf %16, %21 : vector<80x64xf32>
    %c0_22 = arith.constant 0 : index
    %c11 = arith.constant 11 : index
    %c0_23 = arith.constant 0 : index
    %23 = vector.load %arg2[%c0_22, %c11, %c0_23] : memref<1x120x64xbf16, #tpu.memory_space<vmem>>, vector<1x80x64xbf16>
    %24 = vector.shape_cast %23 : vector<1x80x64xbf16> to vector<80x64xbf16>
    %c4 = arith.constant 4 : index
    %c0_24 = arith.constant 0 : index
    %c0_25 = arith.constant 0 : index
    %25 = vector.load %arg3[%c4, %c0_24, %c0_25] : memref<9x64x64xbf16, #tpu.memory_space<vmem>>, vector<1x64x64xbf16>
    %26 = vector.shape_cast %25 : vector<1x64x64xbf16> to vector<64x64xbf16>
    %cst_26 = arith.constant dense<0.000000e+00> : vector<80x64xf32>
    %27 = tpu.matmul %24, %26, %cst_26 {dimension_numbers = #tpu.dot_dimension_numbers<[1], [0], [0], [1], [0, 0, 1, 1], [], []>} : vector<80x64xbf16>, vector<64x64xbf16>, vector<80x64xf32> -> vector<80x64xf32>
    %28 = arith.addf %22, %27 : vector<80x64xf32>
    %c0_27 = arith.constant 0 : index
    %c12 = arith.constant 12 : index
    %c0_28 = arith.constant 0 : index
    %29 = vector.load %arg2[%c0_27, %c12, %c0_28] : memref<1x120x64xbf16, #tpu.memory_space<vmem>>, vector<1x80x64xbf16>
    %30 = vector.shape_cast %29 : vector<1x80x64xbf16> to vector<80x64xbf16>
    %c5 = arith.constant 5 : index
    %c0_29 = arith.constant 0 : index
    %c0_30 = arith.constant 0 : index
    %31 = vector.load %arg3[%c5, %c0_29, %c0_30] : memref<9x64x64xbf16, #tpu.memory_space<vmem>>, vector<1x64x64xbf16>
    %32 = vector.shape_cast %31 : vector<1x64x64xbf16> to vector<64x64xbf16>
    %cst_31 = arith.constant dense<0.000000e+00> : vector<80x64xf32>
    %33 = tpu.matmul %30, %32, %cst_31 {dimension_numbers = #tpu.dot_dimension_numbers<[1], [0], [0], [1], [0, 0, 1, 1], [], []>} : vector<80x64xbf16>, vector<64x64xbf16>, vector<80x64xf32> -> vector<80x64xf32>
    %34 = arith.addf %28, %33 : vector<80x64xf32>
    %c0_32 = arith.constant 0 : index
    %c20 = arith.constant 20 : index
    %c0_33 = arith.constant 0 : index
    %35 = vector.load %arg2[%c0_32, %c20, %c0_33] : memref<1x120x64xbf16, #tpu.memory_space<vmem>>, vector<1x80x64xbf16>
    %36 = vector.shape_cast %35 : vector<1x80x64xbf16> to vector<80x64xbf16>
    %c6 = arith.constant 6 : index
    %c0_34 = arith.constant 0 : index
    %c0_35 = arith.constant 0 : index
    %37 = vector.load %arg3[%c6, %c0_34, %c0_35] : memref<9x64x64xbf16, #tpu.memory_space<vmem>>, vector<1x64x64xbf16>
    %38 = vector.shape_cast %37 : vector<1x64x64xbf16> to vector<64x64xbf16>
    %cst_36 = arith.constant dense<0.000000e+00> : vector<80x64xf32>
    %39 = tpu.matmul %36, %38, %cst_36 {dimension_numbers = #tpu.dot_dimension_numbers<[1], [0], [0], [1], [0, 0, 1, 1], [], []>} : vector<80x64xbf16>, vector<64x64xbf16>, vector<80x64xf32> -> vector<80x64xf32>
    %40 = arith.addf %34, %39 : vector<80x64xf32>
    %c0_37 = arith.constant 0 : index
    %c21 = arith.constant 21 : index
    %c0_38 = arith.constant 0 : index
    %41 = vector.load %arg2[%c0_37, %c21, %c0_38] : memref<1x120x64xbf16, #tpu.memory_space<vmem>>, vector<1x80x64xbf16>
    %42 = vector.shape_cast %41 : vector<1x80x64xbf16> to vector<80x64xbf16>
    %c7 = arith.constant 7 : index
    %c0_39 = arith.constant 0 : index
    %c0_40 = arith.constant 0 : index
    %43 = vector.load %arg3[%c7, %c0_39, %c0_40] : memref<9x64x64xbf16, #tpu.memory_space<vmem>>, vector<1x64x64xbf16>
    %44 = vector.shape_cast %43 : vector<1x64x64xbf16> to vector<64x64xbf16>
    %cst_41 = arith.constant dense<0.000000e+00> : vector<80x64xf32>
    %45 = tpu.matmul %42, %44, %cst_41 {dimension_numbers = #tpu.dot_dimension_numbers<[1], [0], [0], [1], [0, 0, 1, 1], [], []>} : vector<80x64xbf16>, vector<64x64xbf16>, vector<80x64xf32> -> vector<80x64xf32>
    %46 = arith.addf %40, %45 : vector<80x64xf32>
    %c0_42 = arith.constant 0 : index
    %c22 = arith.constant 22 : index
    %c0_43 = arith.constant 0 : index
    %47 = vector.load %arg2[%c0_42, %c22, %c0_43] : memref<1x120x64xbf16, #tpu.memory_space<vmem>>, vector<1x80x64xbf16>
    %48 = vector.shape_cast %47 : vector<1x80x64xbf16> to vector<80x64xbf16>
    %c8 = arith.constant 8 : index
    %c0_44 = arith.constant 0 : index
    %c0_45 = arith.constant 0 : index
    %49 = vector.load %arg3[%c8, %c0_44, %c0_45] : memref<9x64x64xbf16, #tpu.memory_space<vmem>>, vector<1x64x64xbf16>
    %50 = vector.shape_cast %49 : vector<1x64x64xbf16> to vector<64x64xbf16>
    %cst_46 = arith.constant dense<0.000000e+00> : vector<80x64xf32>
    %51 = tpu.matmul %48, %50, %cst_46 {dimension_numbers = #tpu.dot_dimension_numbers<[1], [0], [0], [1], [0, 0, 1, 1], [], []>} : vector<80x64xbf16>, vector<64x64xbf16>, vector<80x64xf32> -> vector<80x64xf32>
    %52 = arith.addf %46, %51 : vector<80x64xf32>
    %c0_47 = arith.constant 0 : index
    %c0_48 = arith.constant 0 : index
    %53 = vector.load %arg4[%c0_47, %c0_48] : memref<1x64xf32, #tpu.memory_space<vmem>>, vector<1x64xf32>
    %54 = vector.broadcast %53 : vector<1x64xf32> to vector<80x64xf32>
    %55 = arith.addf %52, %54 : vector<80x64xf32>
    %c0_49 = arith.constant 0 : index
    %c11_50 = arith.constant 11 : index
    %c0_51 = arith.constant 0 : index
    %56 = vector.load %arg5[%c0_49, %c11_50, %c0_51] : memref<1x120x64xbf16, #tpu.memory_space<vmem>>, vector<1x80x64xbf16>
    %57 = vector.shape_cast %56 : vector<1x80x64xbf16> to vector<80x64xbf16>
    %58 = arith.extf %57 : vector<80x64xbf16> to vector<80x64xf32>
    %59 = arith.addf %55, %58 : vector<80x64xf32>
    %cst_52 = arith.constant 0.000000e+00 : f32
    %60 = vector.broadcast %cst_52 : f32 to vector<80x64xf32>
    %61 = arith.maximumf %59, %60 : vector<80x64xf32>
    %62 = tpu.iota {dimensions = array<i32: 0>} : vector<80x64xi32>
    %c1_i32 = arith.constant 1 : i32
    %63 = vector.broadcast %c1_i32 : i32 to vector<80x64xi32>
    %64 = arith.addi %62, %63 : vector<80x64xi32>
    %c10_i32 = arith.constant 10 : i32
    %c0_i32 = arith.constant 0 : i32
    %65 = arith.cmpi eq, %c10_i32, %c0_i32 : i32
    %c1_i32_53 = arith.constant 1 : i32
    %66 = arith.select %65, %c1_i32_53, %c10_i32 : i32
    %67 = vector.broadcast %66 : i32 to vector<80x64xi32>
    %68 = arith.remsi %64, %67 : vector<80x64xi32>
    %c0_i32_54 = arith.constant 0 : i32
    %69 = vector.broadcast %c0_i32_54 : i32 to vector<80x64xi32>
    %70 = arith.cmpi ne, %68, %69 : vector<80x64xi32>
    %c0_i32_55 = arith.constant 0 : i32
    %71 = vector.broadcast %c0_i32_55 : i32 to vector<80x64xi32>
    %72 = arith.cmpi slt, %68, %71 : vector<80x64xi32>
    %c0_i32_56 = arith.constant 0 : i32
    %73 = arith.cmpi slt, %66, %c0_i32_56 : i32
    %74 = vector.broadcast %73 : i1 to vector<80x64xi1>
    %75 = vector.broadcast %74 : vector<80x64xi1> to vector<80x64xi1>
    %76 = arith.xori %72, %75 : vector<80x64xi1>
    %77 = arith.andi %76, %70 : vector<80x64xi1>
    %78 = vector.broadcast %66 : i32 to vector<80x64xi32>
    %79 = arith.addi %68, %78 : vector<80x64xi32>
    %80 = arith.select %77, %79, %68 : vector<80x64xi1>, vector<80x64xi32>
    %c1_i32_57 = arith.constant 1 : i32
    %81 = vector.broadcast %c1_i32_57 : i32 to vector<80x64xi32>
    %82 = arith.cmpi sge, %80, %81 : vector<80x64xi32>
    %c8_i32 = arith.constant 8 : i32
    %83 = vector.broadcast %c8_i32 : i32 to vector<80x64xi32>
    %84 = arith.cmpi sle, %80, %83 : vector<80x64xi32>
    %85 = arith.andi %82, %84 : vector<80x64xi1>
    %cst_58 = arith.constant 0.000000e+00 : f32
    %86 = vector.broadcast %cst_58 : f32 to vector<80x64xf32>
    %87 = arith.select %85, %61, %86 : vector<80x64xi1>, vector<80x64xf32>
    %cst_59 = arith.constant 0.000000e+00 : bf16
    %88 = vector.broadcast %cst_59 : bf16 to vector<11x64xbf16>
    %c0_60 = arith.constant 0 : index
    %c0_61 = arith.constant 0 : index
    %c0_62 = arith.constant 0 : index
    %89 = vector.load %arg6[%c0_60, %c0_61, %c0_62] : memref<1x120x64xbf16, #tpu.memory_space<vmem>>, vector<1x11x64xbf16>
    %90 = vector.shape_cast %89 : vector<1x11x64xbf16> to vector<11x64xbf16>
    %91 = vector.shape_cast %88 : vector<11x64xbf16> to vector<1x11x64xbf16>
    tpu.vector_store %arg6[%c0_60, %c0_61, %c0_62], %91 {strides = array<i32>} : memref<1x120x64xbf16, #tpu.memory_space<vmem>>, vector<1x11x64xbf16>,
    %92 = arith.truncf %87 : vector<80x64xf32> to vector<80x64xbf16>
    %c0_63 = arith.constant 0 : index
    %c11_64 = arith.constant 11 : index
    %c0_65 = arith.constant 0 : index
    %93 = vector.load %arg6[%c0_63, %c11_64, %c0_65] : memref<1x120x64xbf16, #tpu.memory_space<vmem>>, vector<1x80x64xbf16>
    %94 = vector.shape_cast %93 : vector<1x80x64xbf16> to vector<80x64xbf16>
    %95 = vector.shape_cast %92 : vector<80x64xbf16> to vector<1x80x64xbf16>
    tpu.vector_store %arg6[%c0_63, %c11_64, %c0_65], %95 {strides = array<i32>} : memref<1x120x64xbf16, #tpu.memory_space<vmem>>, vector<1x80x64xbf16>,
    %cst_66 = arith.constant 0.000000e+00 : bf16
    %96 = vector.broadcast %cst_66 : bf16 to vector<29x64xbf16>
    %c0_67 = arith.constant 0 : index
    %c91 = arith.constant 91 : index
    %c0_68 = arith.constant 0 : index
    %97 = vector.load %arg6[%c0_67, %c91, %c0_68] : memref<1x120x64xbf16, #tpu.memory_space<vmem>>, vector<1x29x64xbf16>
    %98 = vector.shape_cast %97 : vector<1x29x64xbf16> to vector<29x64xbf16>
    %99 = vector.shape_cast %96 : vector<29x64xbf16> to vector<1x29x64xbf16>
    tpu.vector_store %arg6[%c0_67, %c91, %c0_68], %99 {strides = array<i32>} : memref<1x120x64xbf16, #tpu.memory_space<vmem>>, vector<1x29x64xbf16>,
    return
  }
  func.func @transform_0(%arg0: i32, %arg1: i32) -> (i32, i32, i32) {
    %c0_i32 = arith.constant 0 : i32
    %c0_i32_0 = arith.constant 0 : i32
    %c0_i32_1 = arith.constant 0 : i32
    return %arg1, %c0_i32, %c0_i32_0 : i32, i32, i32
  }
  func.func @transform_1(%arg0: i32, %arg1: i32) -> (i32, i32, i32) {
    %c0_i32 = arith.constant 0 : i32
    %c0_i32_0 = arith.constant 0 : i32
    %c0_i32_1 = arith.constant 0 : i32
    return %c0_i32, %c0_i32_0, %arg0 : i32, i32, i32
  }
  func.func @transform_2(%arg0: i32, %arg1: i32) -> (i32, i32) {
    %c0_i32 = arith.constant 0 : i32
    %c0_i32_0 = arith.constant 0 : i32
    return %c0_i32, %arg0 : i32, i32
  }
  func.func @transform_3(%arg0: i32, %arg1: i32) -> (i32, i32, i32) {
    %c0_i32 = arith.constant 0 : i32
    %c0_i32_0 = arith.constant 0 : i32
    return %arg1, %c0_i32, %arg0 : i32, i32, i32
  }
  func.func @transform_4(%arg0: i32, %arg1: i32) -> (i32, i32, i32) {
    %c0_i32 = arith.constant 0 : i32
    %c0_i32_0 = arith.constant 0 : i32
    return %arg1, %c0_i32, %arg0 : i32, i32, i32
  }
}

</mosaic_0001>

<bundles_post_ra>
// kernel: tpu_custom_call.1
= control target key start
LH: loop header
LB: loop body
LE: loop exit
PB: predicated region body
PF: predicated region fallthrough
CT: control target
= control target key end

     0   :  { %s3124_s15 = smov 0   ;;  %s3126_s16 = smov 0   ;;  %s4181_s0 = inlined_call_operand.vmem [shape: bf16[2,120,64], index: 0, kind: input, shape index: {}]   ;;  %s4182_s1 = inlined_call_operand.vmem [shape: bf16[9,64,64], index: 1, kind: input, shape index: {}]   ;;  %s4183_s2 = inlined_call_operand.vmem [shape: f32[1,64], index: 2, kind: input, shape index: {}]   ;;  %s4184_s3 = inlined_call_operand.vmem [shape: bf16[2,120,64], index: 3, kind: input, shape index: {}]   ;;  %s4185_s4 = inlined_call_operand.vmem [shape: bf16[2,120,64], index: 4, kind: output, shape index: {}]  }
   0x1   :  { %s3128_s17 = smov 0  }
   0x2 LB: > { %s23_s18 = sadd.s32 1, %s3090_s16  ;;  %p2409_p0 = scmp.ge.s32.totalorder %s3094_s17, 1  ;;  %s3094_s17 = sphi %s3128_s17, %s14_s17   ;;  %s3090_s16 = sphi %s3126_s16, %s4243_s16   ;;  %s3086_s15 = sphi %s3124_s15, %s4242_s15  }
   0x3   : > { %p24_p1 = scmp.ge.s32.totalorder %s23_s18, 2  ;;  %p208_p2 = scmp.lt.s32.totalorder %s3094_s17, 3 }
   0x5   : > { %s4245_s18 = smov (%p24_p1, %s23_s18), 0  ;;  %p209_p3 = pnand %p2409_p0, %p208_p2 }
   0x6   : > { %v3013_v0 = vld [vmem:[%s4182_s1 + $0x20] sm:$0xff] (!%p209_p3)   ;;  %v3096_v1 = vmov (!%p209_p3), 0.0   ;;  %v3014_v2 = vld [vmem:[%s4182_s1 + $0x28] sm:$0xff] (!%p209_p3)   ;;  %p252_p4 = scmp.lt.s32.totalorder (!%p209_p3), %s3086_s15, 1  ;;  %vm3097_vm0 = vmmov (!%p209_p3), 0   ;;  %v3015_v3 = vld [vmem:[%s4182_s1 + $0x30] sm:$0xff] (!%p209_p3)  }
   0x7   : > { %212 = sbr.rel (%p209_p3) target bundleno = 450 (0x1c2), region = 36  ;;  %2957 = vmatprep.subr.bf16.mxu1 (!%p209_p3), %v3096_v1  ;;  %2705 = vmatprep.subr.bf16.mxu0 (!%p209_p3), %v3096_v1  ;;  %v3016_v4 = vld [vmem:[%s4182_s1 + $0x38] sm:$0xff] (!%p209_p3)   ;;  %vm337_vm1 = vsmask.f32 (!%p209_p3), 7424  ;;  %vm406_vm2 = vcmask (!%p209_p3), 523264   ;;  %v3019_v21 = vld [vmem:[%s4182_s1] sm:$0xff] (!%p209_p3)  }
   0x8   : > { %2961 = vmatpush3.bf16.msra.mxu1 (!%p209_p3), %v3013_v0  ;;  %2706 = vmatpush3.bf16.msra.mxu0 (!%p209_p3), %v3013_v0  ;;  %v3024_v28 = vld [vmem:[%s4182_s1 + $0x40] sm:$0xff] (!%p209_p3)   ;;  %v3020_v31 = vld [vmem:[%s4182_s1 + $0x8] sm:$0xff] (!%p209_p3)   ;;  %v3025_v35 = vld [vmem:[%s4182_s1 + $0x10] sm:$0xff] (!%p209_p3)   ;;  %vm615_vm3 = vcmask (!%p209_p3), 1046528   ;;  %vm943_vm4 = vsmask.f32 (!%p209_p3), 6400 }
   0x9   : > { %2958 = vmatprep.subr.bf16.mxu1 (!%p209_p3), %v3096_v1  ;;  %2707 = vmatprep.subr.bf16.mxu0 (!%p209_p3), %v3096_v1  ;;  %v3026_v36 = vld [vmem:[%s4182_s1 + $0x48] sm:$0xff] (!%p209_p3)   ;;  %v3028_v43 = vld [vmem:[%s4182_s1 + $0x50] sm:$0xff] (!%p209_p3)   ;;  %v3029_v47 = vld [vmem:[%s4182_s1 + $0x18] sm:$0xff] (!%p209_p3)   ;;  %vm1132_vm5 = vcmask (!%p209_p3), 1045504   ;;  %vm4188_vm6 = vcmask (!%p209_p3), 1044480   ;;  %vm2108_vm8 = vcmask (!%p209_p3), 517120  }
   0xa   : > { %2721 = vmatprep.mubr.msk.bf16.mxu1 (!%p209_p3), %vm3097_vm0, %v3096_v1  ;;  %2713 = vmatprep.mubr.msk.bf16.mxu0 (!%p209_p3), %vm3097_vm0, %v3096_v1  ;;  %v3030_v48 = vld [vmem:[%s4182_s1 + $0x58] sm:$0xff] (!%p209_p3)   ;;  %v3033_v53 = vld [vmem:[%s4182_s1 + $0x80] sm:$0xff] (!%p209_p3)   ;;  %v3035_v55 = vld [vmem:[%s4182_s1 + $0x88] sm:$0xff] (!%p209_p3)   ;;  %vm1460_vm7 = vsmask.f32 (!%p209_p3), 5376  ;;  %vm4186_vm11 = vcmask (!%p209_p3), 519168  }
   0xb   : > { %v3032_v56 = vld [vmem:[%s4182_s1 + $0x60] sm:$0xff] (!%p209_p3)   ;;  %v3037_v60 = vld [vmem:[%s4182_s1 + $0x90] sm:$0xff] (!%p209_p3)   ;;  %v3034_v0 = vld [vmem:[%s4182_s1 + $0x68] sm:$0xff] (!%p209_p3)   ;;  %vm4187_vm9 = vsmask.f32 (!%p209_p3), 1280 }
   0xc   : > { %2962 = vmatpush3.bf16.msra.mxu1 (!%p209_p3), %v3014_v2  ;;  %2708 = vmatpush3.bf16.msra.mxu0 (!%p209_p3), %v3014_v2  ;;  %vm3632_vm10 = vmand (!%p209_p3), %vm2108_vm8, %vm4187_vm9  ;;  %vm2256_vm9 = vcmask (!%p209_p3), 519169  }
   0xd   : > { %2959 = vmatprep.subr.bf16.mxu1 (!%p209_p3), %v3096_v1  ;;  %2709 = vmatprep.subr.bf16.mxu0 (!%p209_p3), %v3096_v1 }
   0xe   : > { %s4247_s15 = smov (!%p252_p4, %s3086_s15), 1 }
   0xf   : > { %s3159_s25 = smul.u32 60, %s4247_s15 }
  0x10   : > { %2963 = vmatpush3.bf16.msra.mxu1 %v3015_v3  ;;  %2710 = vmatpush3.bf16.msra.mxu0 %v3015_v3 }
  0x11   : > { %s3170_s30 = scalar_lea.vmem %s4181_s0, %s3159_s25  ;;  %2960 = vmatprep.subr.bf16.mxu1 %v3096_v1  ;;  %2711 = vmatprep.subr.bf16.mxu0 %v3096_v1  ;;  %s3626_s7 = scalar_lea.vmem %s4185_s4, %s3159_s25 }
  0x12   : > { %v3173_v5 = vld [vmem:[%s3170_s30 + $0x10] sm:$0xff]   ;;  %v3176_v6 = vld [vmem:[%s3170_s30 + $0x18] sm:$0xff]   ;;  %v281_v7 = vld [vmem:[%s3170_s30] sm:$0xf]  ;;  %s3715_s10 = scalar_lea.vmem %s4184_s3, %s3159_s25 }
  0x13   : > { %v3182_v8 = vld [vmem:[%s3170_s30 + $0x4] sm:$0xf]  ;;  %v354_v9 = vshll.u32 %v3173_v5, 16  ;;  %v358_v10 = vshrl.u32 %v3173_v5, 16  ;;  %v362_v11 = vshll.u32 %v3176_v6, 16  ;;  %v3191_v13 = vld [vmem:[%s3170_s30 + $0x8] sm:$0xff]  }
  0x14   : > { %v3188_v12 = vcombine.low %v281_v7, %v3182_v8  ;;  %v3194_v14 = vld [vmem:[%s3170_s30 + $0x20] sm:$0xff]   ;;  %2964 = vmatpush3.bf16.msra.mxu1 %v3016_v4  ;;  %2712 = vmatpush3.bf16.msra.mxu0 %v3016_v4  ;;  %v346_v19 = vshll.u32 %v3191_v13, 16  ;;  %v366_v23 = vshrl.u32 %v3176_v6, 16  ;;  %v350_v29 = vshrl.u32 %v3191_v13, 16  ;;  %v3039_v7 = vld [vmem:[%s4182_s1 + $0x98] sm:$0xff]  }
  0x15   : > { %v356_v15 = vrot.slane %v354_v9, 1  ;;  %v364_v16 = vrot.slane %v362_v11, 1  ;;  %2733 = vmatprep.subr.bf16.mxu1 %v3096_v1  ;;  %2761 = vmatprep.subr.bf16.mxu0 %v3096_v1  ;;  %v370_v24 = vshll.u32 %v3194_v14, 16  ;;  %v3213_v30 = vld [vmem:[%s3170_s30 + $0x28] ss:$0 sps:$4 sm:$0x11]  }
  0x16   : > { %v339_v17 = vshrl.u32 %v3188_v12, 16  ;;  %v341_v18 = vshll.u32 %v3188_v12, 16  ;;  %v348_v25 = vrot.slane %v346_v19, 1  ;;  %v602_v38 = vld [vmem:[%s3170_s30] sm:$0xe]  ;;  %v374_v40 = vshrl.u32 %v3194_v14, 16 }
  0x17   : > { %v360_v20 = vor.u32 %v358_v10, %v356_v15  ;;  %v368_v33 = vor.u32 %v366_v23, %v364_v16  ;;  %v372_v34 = vrot.slane %v370_v24, 1  ;;  %v378_v41 = vshll.u32 %v3213_v30, 16  ;;  %v3280_v57 = vld [vmem:[%s3170_s30 + $0x1c] sm:$0xff]   ;;  %v3283_v58 = vld [vmem:[%s3170_s30 + $0x24] sm:$0xff]   ;;  %v3036_v9 = vld [vmem:[%s4182_s1 + $0x70] sm:$0xff]  }
  0x18   : > { %v343_v22 = vrot.slane %v341_v18, 1  ;;  %v352_v37 = vor.u32 %v350_v29, %v348_v25  ;;  %v2453_v44 = vcombine.low %v602_v38, %v3182_v8  ;;  %v617_v50 = vrot.slane %v3191_v13, 1  ;;  %v3052_v63 = vld [vmem:[%s3170_s30 + $0x2c] ss:$0 sps:$4 sm:$0x11]  }
  0x19   : > { %v365_v26 = vsel %vm337_vm1, %v360_v20, %v364_v16  ;;  %v373_v39 = vsel %vm337_vm1, %v368_v33, %v372_v34  ;;  %v376_v45 = vor.u32 %v374_v40, %v372_v34  ;;  %v380_v46 = vrot.slane %v378_v41, 1  ;;  %v3343_v18 = vld [vmem:[%s3170_s30 + $0xc] sm:$0xff]  }
  0x1a   : > { %v344_v27 = vor.u32 %v343_v22, %v339_v17  ;;  %2722 = vmatmul.mubr.msk.bf16.vlgmr.msra.gmra.mrb[0].mxu1 %vm406_vm2, %v365_v26  ;;  %v357_v42 = vsel %vm337_vm1, %v352_v37, %v356_v15  ;;  %v616_v49 = vrot.slane %v2453_v44, 1  ;;  %v619_v54 = vrot.slane %v3173_v5, 1  ;;  %v3337_v15 = vld [vmem:[%s3170_s30 + $0x8] sm:$0xf] }
  0x1b   : > { %2734 = vmatpush3.bf16.msra.mxu1 %v3019_v21  ;;  %2725 = vmatprep.mubr.msk.bf16.mxu1 %vm3097_vm0, %v3096_v1  ;;  %v381_v51 = vsel %vm337_vm1, %v376_v45, %v380_v46  ;;  %v802_v61 = vrot.slane %v3280_v57, 1  ;;  %v804_v62 = vrot.slane %v3283_v58, 1  ;;  %v806_v3 = vrot.slane %v3052_v63, 1  ;;  %v3049_v46 = vld [vmem:[%s4182_s1 + $0xd0] sm:$0xff]  }
  0x1c   : > { %v349_v32 = vsel %vm337_vm1, %v344_v27, %v348_v25  ;;  %2735 = vmatprep.subr.bf16.mxu1 %v3096_v1  ;;  %v618_v52 = vsel %vm615_vm3, %v616_v49, %v617_v50  ;;  %v620_v59 = vsel %vm615_vm3, %v617_v50, %v619_v54  ;;  %v621_v4 = vrot.slane %v3176_v6, 1 }
  0x1d   : > { %2714 = vmatmul.mubr.msk.bf16.vlgmr.msra.gmra.mrb[0].mxu0 %vm406_vm2, %v349_v32  ;;  %v3303_v2 = vsel %vm615_vm3, %v802_v61, %v804_v62  ;;  %v3315_v8 = vsel %vm615_vm3, %v804_v62, %v806_v3  ;;  %v623_v11 = vrot.slane %v3194_v14, 1  ;;  %v625_v19 = vrot.slane %v3213_v30, 1  ;;  %v3051_v62 = vld [vmem:[%s4182_s1 + $0xb8] sm:$0xff]  }
  0x1e   : > { %2762 = vmatpush3.bf16.msra.mxu0 %v3024_v28  ;;  %2717 = vmatprep.mubr.msk.bf16.mxu0 %vm3097_vm0, %v3096_v1  ;;  %v622_v10 = vsel %vm615_vm3, %v619_v54, %v621_v4  ;;  %v953_v22 = vshrl.u32 %v3343_v18, 16  ;;  %v956_v23 = vshll.u32 %v3343_v18, 16  ;;  %v3357_v28 = vld [vmem:[%s3170_s30 + $0x14] sm:$0xff]   ;;  %v798_v37 = vrot.slane %v3343_v18, 1 }
  0x1f   : > { %2763 = vmatprep.subr.bf16.mxu0 %v3096_v1  ;;  %2736 = vmatpush3.bf16.msra.mxu1 %v3020_v31  ;;  %v624_v16 = vsel %vm615_vm3, %v621_v4, %v623_v11  ;;  %v626_v24 = vsel %vm615_vm3, %v623_v11, %v625_v19  ;;  %v962_v31 = vshrl.u32 %v3357_v28, 16  ;;  %v965_v32 = vshll.u32 %v3357_v28, 16  ;;  %v3048_v54 = vld [vmem:[%s4182_s1 + $0xb0] sm:$0xff]   ;;  %v1119_v19 = vld [vmem:[%s3170_s30 + $0x4] sm:$0xc] }
  0x20   : > { %2737 = vmatprep.subr.bf16.mxu1 %v3096_v1  ;;  %v955_v26 = vrot.slane %v953_v22, 1  ;;  %v958_v27 = vrot.slane %v956_v23, 2  ;;  %v971_v40 = vshrl.u32 %v3280_v57, 16  ;;  %v980_v50 = vshrl.u32 %v3283_v58, 16 }
  0x21   : > { %v964_v34 = vrot.slane %v962_v31, 1  ;;  %v2512_v22 = vcombine.low %v1119_v19, %v3337_v15  ;;  %v1136_v31 = vrot.slane %v3357_v28, 2 }
  0x22   : > { %2764 = vmatpush3.bf16.msra.mxu0 %v3026_v36  ;;  %2726 = vmatmul.mubr.msk.bf16.gmra.mrb[4].mxu1 %vm406_vm2, %v373_v39  ;;  %v959_v30 = vor.u32 %v958_v27, %v955_v26  ;;  %v3046_v39 = vld [vmem:[%s4182_s1 + $0xc8] sm:$0xff]   ;;  %v973_v44 = vrot.slane %v971_v40, 1 }
  0x23   : > { %2765 = vmatprep.subr.bf16.mxu0 %v3096_v1  ;;  %2738 = vmatpush3.bf16.msra.mxu1 %v3025_v35  ;;  %v967_v35 = vrot.slane %v965_v32, 2  ;;  %v3062_v26 = vld [vmem:[%s4182_s1 + $0x108] sm:$0xff]  }
  0x24   : > { %2729 = vmatprep.mubr.msk.bf16.mxu1 %vm3097_vm0, %v3096_v1  ;;  %2739 = vmatprep.subr.bf16.mxu1 %v3096_v1  ;;  %v3061_v32 = vld [vmem:[%s4182_s1 + $0xe8] sm:$0xff]  }
  0x25   : > { %2718 = vmatmul.mubr.msk.bf16.gmra.mrb[4].mxu0 %vm406_vm2, %v357_v42  ;;  %v968_v38 = vor.u32 %v967_v35, %v964_v34  ;;  %v3042_v42 = vld [vmem:[%s4182_s1 + $0xa0] sm:$0xff]   ;;  %v3064_v34 = vld [vmem:[%s4182_s1 + $0xf0] sm:$0xff]  }
  0x26   : > { %2766 = vmatpush3.bf16.msra.mxu0 %v3028_v43  ;;  %2769 = vmatprep.mubr.msk.bf16.mxu0 %vm3097_vm0, %v3096_v1 }
  0x27   : > { %2767 = vmatprep.subr.bf16.mxu0 %v3096_v1  ;;  %2740 = vmatpush3.bf16.msra.mxu1 %v3029_v47  ;;  %v969_v43 = vsel %vm943_vm4, %v959_v30, %v968_v38  ;;  %v800_v47 = vrot.slane %v3357_v28, 1 }
  0x28   : > { %2789 = vmatprep.subr.bf16.mxu1 %v3096_v1 }
  0x29   : > { %v803_v4 = vsel %vm615_vm3, %v800_v47, %v802_v61  ;;  %v1266_v61 = vld [vmem:[%s3170_s30 + $0x8] sm:$0xc] }
  0x2a   : > { %2768 = vmatpush3.bf16.msra.mxu0 %v3030_v48  ;;  %2730 = vmatmul.mubr.msk.bf16.gmra.mrb[8].mxu1 %vm406_vm2, %v381_v51  ;;  %v3045_v48 = vld [vmem:[%s4182_s1 + $0xa8] sm:$0xff]   ;;  %v983_v51 = vshll.u32 %v3283_v58, 16 }
  0x2b   : > { %2817 = vmatprep.subr.bf16.mxu0 %v3096_v1  ;;  %2741 = vmatprep.mubr.msk.bf16.mxu1 %vm3097_vm0, %v3096_v1 }
  0x2d   : > { %2770 = vmatmul.mubr.msk.bf16.vlgmr.msra.gmra.mrb[8].mxu0 %vm406_vm2, %v618_v52  ;;  %v3054_v52 = vld [vmem:[%s4182_s1 + $0xd8] sm:$0xff]  }
  0x2e   : > { %2818 = vmatpush3.bf16.msra.mxu0 %v3033_v53  ;;  %2773 = vmatprep.mubr.msk.bf16.mxu0 %vm3097_vm0, %v3096_v1  ;;  %v801_v53 = vsel %vm615_vm3, %v798_v37, %v800_v47 }
  0x2f   : > { %2819 = vmatprep.subr.bf16.mxu0 %v3096_v1 }
  0x32   : > { %2820 = vmatpush3.bf16.msra.mxu0 %v3035_v55  ;;  %2742 = vmatmul.mubr.msk.bf16.vlgmr.msra.gmra.mrb[12].mxu1 %vm406_vm2, %v3188_v12  ;;  %v3038_v12 = vld [vmem:[%s4182_s1 + $0x78] sm:$0xff]  }
  0x33   : > { %2821 = vmatprep.subr.bf16.mxu0 %v3096_v1  ;;  %2790 = vmatpush3.bf16.msra.mxu1 %v3032_v56  ;;  %v982_v56 = vrot.slane %v980_v50, 1 }
  0x34   : > { %2745 = vmatprep.mubr.msk.bf16.mxu1 %vm3097_vm0, %v3096_v1  ;;  %2791 = vmatprep.subr.bf16.mxu1 %v3096_v1 }
  0x35   : > { %2774 = vmatmul.mubr.msk.bf16.gmra.mrb[12].mxu0 %vm406_vm2, %v620_v59  ;;  %v985_v59 = vrot.slane %v983_v51, 2 }
  0x36   : > { %2777 = vmatprep.mubr.msk.bf16.mxu0 %vm3097_vm0, %v3096_v1  ;;  %2822 = vmatpush3.bf16.msra.mxu0 %v3037_v60  ;;  %v3419_v60 = vld [vmem:[%s3170_s30 + $0x2c] ss:$0 sps:$4 sm:$0x33]  }
  0x37   : > { %2823 = vmatprep.subr.bf16.mxu0 %v3096_v1  ;;  %2792 = vmatpush3.bf16.msra.mxu1 %v3034_v0  ;;  %v986_v63 = vor.u32 %v985_v59, %v982_v56  ;;  %v989_v0 = vshrl.u32 %v3419_v60, 16  ;;  %v992_v3 = vshll.u32 %v3419_v60, 16  ;;  %v1142_v47 = vrot.slane %v3419_v60, 2 }
  0x38   : > { %2793 = vmatprep.subr.bf16.mxu1 %v3096_v1 }
  0x3a   : > { %2824 = vmatpush3.bf16.msra.mxu0 %v3039_v7  ;;  %2746 = vmatmul.mubr.msk.bf16.gmra.mrb[16].mxu1 %vm406_vm2, %v3191_v13  ;;  %v749_v13 = vld [vmem:[%s3170_s30 + $0x4] sm:$0xe] }
  0x3b   : > { %2873 = vmatprep.subr.bf16.mxu0 %v3096_v1  ;;  %2749 = vmatprep.mubr.msk.bf16.mxu1 %vm3097_vm0, %v3096_v1  ;;  %v2471_v17 = vcombine.low %v749_v13, %v3337_v15 }
  0x3c   : > { %2794 = vmatpush3.bf16.msra.mxu1 %v3036_v9  ;;  %v991_v9 = vrot.slane %v989_v0, 1 }
  0x3d   : > { %2778 = vmatmul.mubr.msk.bf16.gmra.mrb[16].mxu0 %vm406_vm2, %v622_v10  ;;  %2795 = vmatprep.subr.bf16.mxu1 %v3096_v1  ;;  %v945_v20 = vshrl.u32 %v2471_v17, 16  ;;  %v948_v21 = vshll.u32 %v2471_v17, 16  ;;  %v797_v36 = vrot.slane %v2471_v17, 1  ;;  %v994_v10 = vrot.slane %v992_v3, 2  ;;  %v3454_v17 = vld [vmem:[%s3170_s30 + $0x10] sm:$0xff]  }
  0x3e   : > { %2781 = vmatprep.mubr.msk.bf16.mxu0 %vm3097_vm0, %v3096_v1  ;;  %v1473_v50 = vshll.u32 %v3454_v17, 16 }
  0x3f   : > { %v947_v25 = vrot.slane %v945_v20, 1  ;;  %v799_v41 = vsel %vm615_vm3, %v797_v36, %v798_v37  ;;  %v995_v11 = vor.u32 %v994_v10, %v991_v9  ;;  %v3522_v36 = vld [vmem:[%s3170_s30 + $0x28] sm:$0xff]   ;;  %v1138_v37 = vrot.slane %v3280_v57, 2 }
  0x40   : > { %2796 = vmatpush3.bf16.msra.mxu1 %v3038_v12  ;;  %v3447_v12 = vld [vmem:[%s3170_s30 + $0xc] sm:$0xf]  ;;  %v1475_v59 = vrot.slane %v1473_v50, 3 }
  0x41   : > { %2845 = vmatprep.subr.bf16.mxu1 %v3096_v1  ;;  %v996_v13 = vsel %vm943_vm4, %v986_v63, %v995_v11  ;;  %v1139_v40 = vsel %vm1132_vm5, %v1136_v31, %v1138_v37 }
  0x42   : > { %2750 = vmatmul.mubr.msk.bf16.gmra.mrb[20].mxu1 %vm406_vm2, %v3173_v5  ;;  %v950_v5 = vrot.slane %v948_v21, 2  ;;  %v1315_v21 = vrot.slane %v3454_v17, 2 }
  0x43   : > { %2753 = vmatprep.mubr.msk.bf16.mxu1 %vm3097_vm0, %v3096_v1 }
  0x44   : > { %v951_v29 = vor.u32 %v950_v5, %v947_v25  ;;  %v1133_v25 = vrot.slane %v2512_v22, 2  ;;  %v1134_v5 = vrot.slane %v3343_v18, 2  ;;  %v3058_v18 = vld [vmem:[%s4182_s1 + $0xe0] sm:$0xff]  }
  0x45   : > { %2782 = vmatmul.mubr.msk.bf16.gmra.mrb[20].mxu0 %vm406_vm2, %v624_v16  ;;  %v3451_v16 = vcombine.low %v1266_v61, %v3447_v12 }
  0x46   : > { %2785 = vmatprep.mubr.msk.bf16.mxu0 %vm3097_vm0, %v3096_v1  ;;  %v960_v33 = vsel %vm943_vm4, %v951_v29, %v959_v30  ;;  %v3493_v29 = vld [vmem:[%s3170_s30 + $0x20] sm:$0xff]   ;;  %v3065_v30 = vld [vmem:[%s4182_s1 + $0x110] sm:$0xff]   ;;  %v1137_v28 = vsel %vm1132_vm5, %v1134_v5, %v1136_v31 }
  0x47   : > { %v1314_v20 = vrot.slane %v3451_v16, 2 }
  0x49   : > { %v1316_v23 = vsel %vm1132_vm5, %v1314_v20, %v1315_v21 }
  0x4a   : > { %2754 = vmatmul.mubr.msk.bf16.gmra.mrb[24].mxu1 %vm406_vm2, %v3176_v6  ;;  %v3043_v6 = vld [vmem:[%s4182_s1 + $0xc0] sm:$0xff]  }
  0x4b   : > { %2757 = vmatprep.mubr.msk.bf16.mxu1 %vm3097_vm0, %v3096_v1 }
  0x4d   : > { %2786 = vmatmul.mubr.msk.bf16.gmra.mrb[24].mxu0 %vm406_vm2, %v626_v24  ;;  %v3472_v24 = vld [vmem:[%s3170_s30 + $0x18] sm:$0xff]  }
  0x4e   : > { %2825 = vmatprep.mubr.msk.bf16.mxu0 %vm3097_vm0, %v3096_v1  ;;  %v1317_v15 = vrot.slane %v3472_v24, 2  ;;  %v1479_v0 = vshrl.u32 %v3472_v24, 16  ;;  %v1482_v3 = vshll.u32 %v3472_v24, 16 }
  0x50   : > { %v1318_v27 = vsel %vm1132_vm5, %v1315_v21, %v1317_v15  ;;  %v1481_v9 = vrot.slane %v1479_v0, 2  ;;  %v1484_v10 = vrot.slane %v1482_v3, 3 }
  0x52   : > { %2758 = vmatmul.mubr.msk.bf16.gmra.mrb[28].mxu1 %vm406_vm2, %v3194_v14  ;;  %v974_v14 = vshll.u32 %v3280_v57, 16  ;;  %v1485_v61 = vor.u32 %v1484_v10, %v1481_v9 }
  0x53   : > { %2797 = vmatprep.mubr.msk.bf16.mxu1 %vm3097_vm0, %v3096_v1 }
  0x54   : > { %v976_v45 = vrot.slane %v974_v14, 2  ;;  %v3068_v14 = vld [vmem:[%s3170_s30 + $0x30] ss:$0 sps:$4 sm:$0x33]  }
  0x55   : > { %2826 = vmatmul.mubr.msk.bf16.vlgmr.msra.gmra.mrb[28].mxu0 %vm406_vm2, %v960_v33  ;;  %v1319_v33 = vrot.slane %v3493_v29, 2 }
  0x56   : > { %2874 = vmatpush3.bf16.msra.mxu0 %v3043_v6  ;;  %2829 = vmatprep.mubr.msk.bf16.mxu0 %vm3097_vm0, %v3096_v1  ;;  %v977_v49 = vor.u32 %v976_v45, %v973_v44  ;;  %v3069_v6 = vld [vmem:[%s4182_s1 + $0x118] sm:$0xff]  }
  0x57   : > { %2875 = vmatprep.subr.bf16.mxu0 %v3096_v1  ;;  %v1320_v35 = vsel %vm1132_vm5, %v1317_v15, %v1319_v33 }
  0x58   : > { %v978_v55 = vsel %vm943_vm4, %v968_v38, %v977_v49  ;;  %v987_v7 = vsel %vm943_vm4, %v977_v49, %v986_v63  ;;  %v3067_v38 = vld [vmem:[%s4182_s1 + $0xf8] sm:$0xff]   ;;  %v1470_v49 = vshrl.u32 %v3454_v17, 16 }
  0x5a   : > { %2876 = vmatpush3.bf16.msra.mxu0 %v3046_v39  ;;  %2798 = vmatmul.mubr.msk.bf16.vlgmr.msra.gmra.mrb[32].mxu1 %vm406_vm2, %v799_v41  ;;  %v1321_v39 = vrot.slane %v3522_v36, 2  ;;  %v1140_v41 = vrot.slane %v3283_v58, 2  ;;  %v1462_v58 = vshrl.u32 %v3451_v16, 16  ;;  %v1472_v56 = vrot.slane %v1470_v49, 2 }
  0x5b   : > { %2877 = vmatprep.subr.bf16.mxu0 %v3096_v1  ;;  %2846 = vmatpush3.bf16.msra.mxu1 %v3042_v42  ;;  %v1323_v42 = vrot.slane %v3068_v14, 2 }
  0x5c   : > { %2801 = vmatprep.mubr.msk.bf16.mxu1 %vm3097_vm0, %v3096_v1  ;;  %2847 = vmatprep.subr.bf16.mxu1 %v3096_v1  ;;  %v1322_v57 = vsel %vm1132_vm5, %v1319_v33, %v1321_v39  ;;  %v1141_v44 = vsel %vm1132_vm5, %v1138_v37, %v1140_v41  ;;  %v1476_v63 = vor.u32 %v1475_v59, %v1472_v56 }
  0x5d   : > { %2830 = vmatmul.mubr.msk.bf16.gmra.mrb[32].mxu0 %vm406_vm2, %v969_v43  ;;  %v1636_v43 = vld [vmem:[%s3170_s30 + $0x8] sm:$0x8]  ;;  %v1324_v45 = vsel %vm1132_vm5, %v1321_v39, %v1323_v42 }
  0x5e   : > { %2833 = vmatprep.mubr.msk.bf16.mxu0 %vm3097_vm0, %v3096_v1  ;;  %2878 = vmatpush3.bf16.msra.mxu0 %v3049_v46  ;;  %v2571_v46 = vcombine.low %v1636_v43, %v3447_v12  ;;  %v1488_v12 = vshrl.u32 %v3493_v29, 16 }
  0x5f   : > { %2879 = vmatprep.subr.bf16.mxu0 %v3096_v1  ;;  %2848 = vmatpush3.bf16.msra.mxu1 %v3045_v48  ;;  %v1465_v48 = vshll.u32 %v3451_v16, 16  ;;  %v1655_v16 = vrot.slane %v3493_v29, 3 }
  0x60   : > { %2849 = vmatprep.subr.bf16.mxu1 %v3096_v1  ;;  %v1650_v51 = vrot.slane %v2571_v46, 3  ;;  %v1490_v19 = vrot.slane %v1488_v12, 2 }
  0x62   : > { %2880 = vmatpush3.bf16.msra.mxu0 %v3054_v52  ;;  %2802 = vmatmul.mubr.msk.bf16.gmra.mrb[36].mxu1 %vm406_vm2, %v801_v53  ;;  %v1651_v52 = vrot.slane %v3454_v17, 3  ;;  %v1143_v53 = vsel %vm1132_vm5, %v1140_v41, %v1142_v47  ;;  %v1486_v17 = vsel %vm1460_vm7, %v1476_v63, %v1485_v61 }
  0x63   : > { %2929 = vmatprep.subr.bf16.mxu0 %v3096_v1  ;;  %2805 = vmatprep.mubr.msk.bf16.mxu1 %vm3097_vm0, %v3096_v1 }
  0x64   : > { %2850 = vmatpush3.bf16.msra.mxu1 %v3048_v54  ;;  %v1464_v54 = vrot.slane %v1462_v58, 2  ;;  %v1652_v60 = vsel %vm4188_vm6, %v1650_v51, %v1651_v52 }
  0x65   : > { %2834 = vmatmul.mubr.msk.bf16.gmra.mrb[36].mxu0 %vm406_vm2, %v978_v55  ;;  %2851 = vmatprep.subr.bf16.mxu1 %v3096_v1  ;;  %v1467_v55 = vrot.slane %v1465_v48, 3 }
  0x66   : > { %2837 = vmatprep.mubr.msk.bf16.mxu0 %vm3097_vm0, %v3096_v1 }
  0x68   : > { %2852 = vmatpush3.bf16.msra.mxu1 %v3051_v62  ;;  %v1468_v62 = vor.u32 %v1467_v55, %v1464_v54 }
  0x69   : > { %2901 = vmatprep.subr.bf16.mxu1 %v3096_v1 }
  0x6a   : > { %2806 = vmatmul.mubr.msk.bf16.gmra.mrb[40].mxu1 %vm406_vm2, %v803_v4  ;;  %v1653_v4 = vrot.slane %v3472_v24, 3  ;;  %v1657_v24 = vrot.slane %v3522_v36, 3 }
  0x6b   : > { %2809 = vmatprep.mubr.msk.bf16.mxu1 %vm3097_vm0, %v3096_v1 }
  0x6c   : > { %v1654_v11 = vsel %vm4188_vm6, %v1651_v52, %v1653_v4  ;;  %v1656_v21 = vsel %vm4188_vm6, %v1653_v4, %v1655_v16 }
  0x6d   : > { %2838 = vmatmul.mubr.msk.bf16.gmra.mrb[40].mxu0 %vm406_vm2, %v987_v7  ;;  %v1477_v7 = vsel %vm1460_vm7, %v1468_v62, %v1476_v63  ;;  %v2111_v63 = vld [vmem:[%s3626_s7 + $0x4] sm:$0x3] }
  0x6e   : > { %2841 = vmatprep.mubr.msk.bf16.mxu0 %vm3097_vm0, %v3096_v1 }
  0x72   : > { %2810 = vmatmul.mubr.msk.bf16.gmra.mrb[44].mxu1 %vm406_vm2, %v3303_v2  ;;  %v3059_v2 = vld [vmem:[%s4182_s1 + $0x100] sm:$0xff]  }
  0x73   : > { %2813 = vmatprep.mubr.msk.bf16.mxu1 %vm3097_vm0, %v3096_v1 }
  0x75   : > { %2842 = vmatmul.mubr.msk.bf16.gmra.mrb[44].mxu0 %vm406_vm2, %v996_v13  ;;  %v1491_v13 = vshll.u32 %v3493_v29, 16 }
  0x76   : > { %2881 = vmatprep.mubr.msk.bf16.mxu0 %vm3097_vm0, %v3096_v1 }
  0x77   : > { %v1493_v20 = vrot.slane %v1491_v13, 3 }
  0x79   : > { %v1494_v22 = vor.u32 %v1493_v20, %v1490_v19 }
  0x7a   : > { %2814 = vmatmul.mubr.msk.bf16.gmra.mrb[48].mxu1 %vm406_vm2, %v3315_v8  ;;  %v1135_v8 = vsel %vm1132_vm5, %v1133_v25, %v1134_v5 }
  0x7b   : > { %2853 = vmatprep.mubr.msk.bf16.mxu1 %vm3097_vm0, %v3096_v1  ;;  %v1495_v25 = vsel %vm1460_vm7, %v1485_v61, %v1494_v22 }
  0x7d   : > { %2882 = vmatmul.mubr.msk.bf16.vlgmr.msra.gmra.mrb[48].mxu0 %vm406_vm2, %v1316_v23  ;;  %v1497_v23 = vshrl.u32 %v3522_v36, 16 }
  0x7e   : > { %2930 = vmatpush3.bf16.msra.mxu0 %v3059_v2  ;;  %2885 = vmatprep.mubr.msk.bf16.mxu0 %vm3097_vm0, %v3096_v1  ;;  %v1500_v2 = vshll.u32 %v3522_v36, 16 }
  0x7f   : > { %2931 = vmatprep.subr.bf16.mxu0 %v3096_v1  ;;  %v1499_v5 = vrot.slane %v1497_v23, 2 }
  0x80   : > { %v1502_v15 = vrot.slane %v1500_v2, 3 }
  0x82   : > { %2932 = vmatpush3.bf16.msra.mxu0 %v3062_v26  ;;  %2854 = vmatmul.mubr.msk.bf16.vlgmr.msra.gmra.mrb[52].mxu1 %vm406_vm2, %v1135_v8  ;;  %v3071_v26 = vld [vmem:[%s3170_s30 + $0x30] ss:$0 sps:$4 sm:$0x77]   ;;  %v1658_v8 = vsel %vm4188_vm6, %v1655_v16, %v1657_v24 }
  0x83   : > { %2933 = vmatprep.subr.bf16.mxu0 %v3096_v1  ;;  %2902 = vmatpush3.bf16.msra.mxu1 %v3058_v18  ;;  %v1503_v18 = vor.u32 %v1502_v15, %v1499_v5  ;;  %v1509_v29 = vshll.u32 %v3071_v26, 16  ;;  %v3098_v15 = vmov 0  }
  0x84   : > { %2857 = vmatprep.mubr.msk.bf16.mxu1 %vm3097_vm0, %v3096_v1  ;;  %2903 = vmatprep.subr.bf16.mxu1 %v3096_v1  ;;  %2107 = vst.msk [vmem:[%s3626_s7] sm:$0xf] %vm4186_vm11, %v3098_v15  ;;  %2277 = vst.msk [vmem:[%s3626_s7 + $0x30] sm:$0xf] %vm4186_vm11, %v3098_v15 }
  0x85   : > { %2886 = vmatmul.mubr.msk.bf16.gmra.mrb[52].mxu0 %vm406_vm2, %v1318_v27  ;;  %v1506_v27 = vshrl.u32 %v3071_v26, 16  ;;  %v1504_v31 = vsel %vm1460_vm7, %v1494_v22, %v1503_v18  ;;  %v1511_v33 = vrot.slane %v1509_v29, 3  ;;  %2278 = vst.msk [vmem:[%s3626_s7 + $0x34] sm:$0xf] %vm4186_vm11, %v3098_v15  ;;  %2279 = vst.msk [vmem:[%s3626_s7 + $0x38] sm:$0xf] %vm4186_vm11, %v3098_v15 }
  0x86   : > { %2889 = vmatprep.mubr.msk.bf16.mxu0 %vm3097_vm0, %v3096_v1  ;;  %2934 = vmatpush3.bf16.msra.mxu0 %v3065_v30  ;;  %v1659_v30 = vrot.slane %v3071_v26, 3 }
  0x87   : > { %2935 = vmatprep.subr.bf16.mxu0 %v3096_v1  ;;  %2904 = vmatpush3.bf16.msra.mxu1 %v3061_v32  ;;  %v1508_v32 = vrot.slane %v1506_v27, 2 }
  0x88   : > { %2905 = vmatprep.subr.bf16.mxu1 %v3096_v1 }
  0x8a   : > { %2936 = vmatpush3.bf16.msra.mxu0 %v3069_v6  ;;  %2858 = vmatmul.mubr.msk.bf16.gmra.mrb[56].mxu1 %vm406_vm2, %v1137_v28  ;;  %v1660_v6 = vsel %vm4188_vm6, %v1657_v24, %v1659_v30  ;;  %v1512_v28 = vor.u32 %v1511_v33, %v1508_v32 }
  0x8b   : > { %2861 = vmatprep.mubr.msk.bf16.mxu1 %vm3097_vm0, %v3096_v1  ;;  %2906 = vmatpush3.bf16.msra.mxu1 %v3064_v34 }
  0x8c   : > { %2907 = vmatprep.subr.bf16.mxu1 %v3096_v1  ;;  %v1513_v34 = vsel %vm1460_vm7, %v1503_v18, %v1512_v28 }
  0x8d   : > { %2890 = vmatmul.mubr.msk.bf16.gmra.mrb[56].mxu0 %vm406_vm2, %v1320_v35 }
  0x8e   : > { %2893 = vmatprep.mubr.msk.bf16.mxu0 %vm3097_vm0, %v3096_v1 }
  0x8f   : > { %2908 = vmatpush3.bf16.msra.mxu1 %v3067_v38 }
  0x92   : > { %2862 = vmatmul.mubr.msk.bf16.gmra.mrb[60].mxu1 %vm406_vm2, %v1139_v40 }
  0x93   : > { %2865 = vmatprep.mubr.msk.bf16.mxu1 %vm3097_vm0, %v3096_v1 }
  0x95   : > { %2894 = vmatmul.mubr.msk.bf16.gmra.mrb[60].mxu0 %vm406_vm2, %v1322_v57 }
  0x96   : > { %2897 = vmatprep.mubr.msk.bf16.mxu0 %vm3097_vm0, %v3096_v1 }
  0x9a   : > { %2866 = vmatmul.mubr.msk.bf16.gmra.mrb[64].mxu1 %vm406_vm2, %v1141_v44 }
  0x9b   : > { %2869 = vmatprep.mubr.msk.bf16.mxu1 %vm3097_vm0, %v3096_v1 }
  0x9d   : > { %2898 = vmatmul.mubr.msk.bf16.gmra.mrb[64].mxu0 %vm406_vm2, %v1324_v45 }
  0x9e   : > { %2937 = vmatprep.mubr.msk.bf16.mxu0 %vm3097_vm0, %v3096_v1 }
  0xa2   : > { %2870 = vmatmul.mubr.msk.bf16.gmra.mrb[68].mxu1 %vm406_vm2, %v1143_v53 }
  0xa3   : > { %2909 = vmatprep.mubr.msk.bf16.mxu1 %vm3097_vm0, %v3096_v1 }
  0xa5   : > { %2938 = vmatmul.mubr.msk.bf16.vlgmr.msra.gmra.mrb[68].mxu0 %vm406_vm2, %v1652_v60 }
  0xa6   : > { %2941 = vmatprep.mubr.msk.bf16.mxu0 %vm3097_vm0, %v3096_v1 }
  0xaa   : > { %2910 = vmatmul.mubr.msk.bf16.vlgmr.msra.gmra.mrb[72].mxu1 %vm406_vm2, %v1477_v7 }
  0xab   : > { %2913 = vmatprep.mubr.msk.bf16.mxu1 %vm3097_vm0, %v3096_v1 }
  0xad   : > { %2942 = vmatmul.mubr.msk.bf16.gmra.mrb[72].mxu0 %vm406_vm2, %v1654_v11  ;;  %v2112_v11 = vsel %vm3632_vm10, 0, %v2111_v63 }
  0xae   : > { %2945 = vmatprep.mubr.msk.bf16.mxu0 %vm3097_vm0, %v3096_v1  ;;  %2113 = vst [vmem:[%s3626_s7 + $0x4] sm:$0x3] %v2112_v11 }
  0xb2   : > { %2914 = vmatmul.mubr.msk.bf16.gmra.mrb[76].mxu1 %vm406_vm2, %v1486_v17 }
  0xb3   : > { %2917 = vmatprep.mubr.msk.bf16.mxu1 %vm3097_vm0, %v3096_v1 }
  0xb5   : > { %2946 = vmatmul.mubr.msk.bf16.gmra.mrb[76].mxu0 %vm406_vm2, %v1656_v21 }
  0xb6   : > { %2949 = vmatprep.mubr.msk.bf16.mxu0 %vm3097_vm0, %v3096_v1 }
  0xba   : > { %2918 = vmatmul.mubr.msk.bf16.gmra.mrb[80].mxu1 %vm406_vm2, %v1495_v25 }
  0xbb   : > { %2921 = vmatprep.mubr.msk.bf16.mxu1 %vm3097_vm0, %v3096_v1 }
  0xbd   : > { %2950 = vmatmul.mubr.msk.bf16.gmra.mrb[80].mxu0 %vm406_vm2, %v1658_v8 }
  0xbe   : > { %2953 = vmatprep.mubr.msk.bf16.mxu0 %vm3097_vm0, %v3096_v1 }
  0xc2   : > { %2922 = vmatmul.mubr.msk.bf16.gmra.mrb[84].mxu1 %vm406_vm2, %v1504_v31 }
  0xc3   : > { %2925 = vmatprep.mubr.msk.bf16.mxu1 %vm3097_vm0, %v3096_v1 }
  0xc5   : > { %2954 = vmatmul.mubr.msk.bf16.gmra.mrb[84].mxu0 %vm406_vm2, %v1660_v6 }
  0xca   : > { %2926 = vmatmul.mubr.msk.bf16.gmra.mrb[88].mxu1 %vm406_vm2, %v1513_v34 }
  0xed   : > { %v472_v35 = vpop.f32.mrb[0].mxu1 }
  0xee   : > { %v2723_v36 = vpop.f32.mrb[1].mxu1 }
  0xef   : > { %v3612_v37 = vpop.f32.mrb[2].mxu1 }
  0xf0   : > { %v456_v38 = vpop.f32.mrb[0].mxu0  ;;  %v2724_v39 = vpop.f32.mrb[3].mxu1 }
  0xf1   : > { %v2715_v40 = vpop.f32.mrb[1].mxu0 }
  0xf2   : > { %v459_v57 = vpop.f32.mrb[2].mxu0 }
  0xf3   : > { %v2716_v14 = vpop.f32.mrb[3].mxu0 }
  0xf5   : > { %v3614_v41 = vpop.f32.mrb[4].mxu1 }
  0xf6   : > { %v2727_v1 = vpop.f32.mrb[5].mxu1 }
  0xf7   : > { %v3616_v42 = vpop.f32.mrb[6].mxu1 }
  0xf8   : > { %v464_v43 = vpop.f32.mrb[4].mxu0  ;;  %v2728_v44 = vpop.f32.mrb[7].mxu1 }
  0xf9   : > { %v2719_v45 = vpop.f32.mrb[5].mxu0 }
  0xfa   : > { %v467_v46 = vpop.f32.mrb[6].mxu0 }
  0xfb   : > { %v2720_v47 = vpop.f32.mrb[7].mxu0 }
  0xfd   : > { %v3618_v58 = vpop.f32.mrb[8].mxu1 }
  0xfe   : > { %v2731_v48 = vpop.f32.mrb[9].mxu1 }
  0xff   : > { %v3620_v49 = vpop.f32.mrb[10].mxu1 }
 0x100   : > { %v700_v50 = vpop.f32.mrb[8].mxu0  ;;  %v2732_v51 = vpop.f32.mrb[11].mxu1 }
 0x101   : > { %v2771_v52 = vpop.f32.mrb[9].mxu0 }
 0x102   : > { %v703_v53 = vpop.f32.mrb[10].mxu0 }
 0x103   : > { %v2772_v54 = vpop.f32.mrb[11].mxu0 }
 0x105   : > { %v563_v55 = vpop.f32.mrb[12].mxu1 }
 0x106   : > { %v564_v56 = vadd.f32 %v563_v55, %v456_v38  ;;  %v2743_v59 = vpop.f32.mrb[13].mxu1 }
 0x107   : > { %v566_v60 = vpop.f32.mrb[14].mxu1 }
 0x108   : > { %v708_v62 = vpop.f32.mrb[12].mxu0  ;;  %v3629_v0 = vadd.f32 %v700_v50, %v564_v56  ;;  %v567_v3 = vadd.f32 %v566_v60, %v459_v57  ;;  %v2744_v4 = vpop.f32.mrb[15].mxu1 }
 0x109   : > { %v2775_v7 = vpop.f32.mrb[13].mxu0 }
 0x10a   : > { %v711_v10 = vpop.f32.mrb[14].mxu0  ;;  %v3638_v61 = vadd.f32 %v703_v53, %v567_v3 }
 0x10b   : > { %v2776_v12 = vpop.f32.mrb[15].mxu0 }
 0x10d   : > { %v571_v13 = vpop.f32.mrb[16].mxu1 }
 0x10e   : > { %v572_v16 = vadd.f32 %v571_v13, %v464_v43  ;;  %v2747_v17 = vpop.f32.mrb[17].mxu1 }
 0x10f   : > { %v574_v19 = vpop.f32.mrb[18].mxu1 }
 0x110   : > { %v716_v20 = vpop.f32.mrb[16].mxu0  ;;  %v741_v21 = vadd.f32 %v708_v62, %v572_v16  ;;  %v575_v22 = vadd.f32 %v574_v19, %v467_v46  ;;  %v2748_v23 = vpop.f32.mrb[19].mxu1 }
 0x111   : > { %v2779_v2 = vpop.f32.mrb[17].mxu0 }
 0x112   : > { %v719_v24 = vpop.f32.mrb[18].mxu0  ;;  %v742_v25 = vadd.f32 %v711_v10, %v575_v22 }
 0x113   : > { %v2780_v5 = vpop.f32.mrb[19].mxu0 }
 0x115   : > { %v579_v26 = vpop.f32.mrb[20].mxu1 }
 0x116   : > { %v580_v8 = vadd.f32 %v579_v26, %v472_v35  ;;  %v2751_v18 = vpop.f32.mrb[21].mxu1 }
 0x117   : > { %v582_v27 = vpop.f32.mrb[22].mxu1 }
 0x118   : > { %v724_v29 = vpop.f32.mrb[20].mxu0  ;;  %v743_v30 = vadd.f32 %v716_v20, %v580_v8  ;;  %v583_v31 = vadd.f32 %v582_v27, %v3612_v37  ;;  %v2752_v32 = vpop.f32.mrb[23].mxu1 }
 0x119   : > { %v2783_v33 = vpop.f32.mrb[21].mxu0 }
 0x11a   : > { %v727_v6 = vpop.f32.mrb[22].mxu0  ;;  %v744_v28 = vadd.f32 %v719_v24, %v583_v31 }
 0x11b   : > { %v2784_v34 = vpop.f32.mrb[23].mxu0 }
 0x11d   : > { %v587_v36 = vpop.f32.mrb[24].mxu1 }
 0x11e   : > { %v588_v38 = vadd.f32 %v587_v36, %v3614_v41  ;;  %v2755_v39 = vpop.f32.mrb[25].mxu1 }
 0x11f   : > { %v590_v40 = vpop.f32.mrb[26].mxu1 }
 0x120   : > { %v732_v57 = vpop.f32.mrb[24].mxu0  ;;  %v745_v14 = vadd.f32 %v724_v29, %v588_v38  ;;  %v591_v35 = vadd.f32 %v590_v40, %v3616_v42  ;;  %v2756_v1 = vpop.f32.mrb[27].mxu1 }
 0x121   : > { %v2787_v43 = vpop.f32.mrb[25].mxu0 }
 0x122   : > { %v735_v44 = vpop.f32.mrb[26].mxu0  ;;  %v746_v45 = vadd.f32 %v727_v6, %v591_v35 }
 0x123   : > { %v2788_v46 = vpop.f32.mrb[27].mxu0 }
 0x124   : > { %v1885_v46 = vlaneseq }
 0x125   : > { %v595_v37 = vpop.f32.mrb[28].mxu1 }
 0x126   : > { %v596_v47 = vadd.f32 %v595_v37, %v3618_v58  ;;  %v2759_v48 = vpop.f32.mrb[29].mxu1 }
 0x127   : > { %v598_v50 = vpop.f32.mrb[30].mxu1 }
 0x128   : > { %v1070_v51 = vpop.f32.mrb[28].mxu0  ;;  %v747_v52 = vadd.f32 %v732_v57, %v596_v47  ;;  %v599_v41 = vadd.f32 %v598_v50, %v3620_v49  ;;  %v2760_v53 = vpop.f32.mrb[31].mxu1 }
 0x129   : > { %v2827_v54 = vpop.f32.mrb[29].mxu0 }
 0x12a   : > { %v1073_v55 = vpop.f32.mrb[30].mxu0  ;;  %v748_v56 = vadd.f32 %v735_v44, %v599_v41  ;;  %v3668_v41 = vshrl.u32 %v1885_v46, 7 }
 0x12b   : > { %v2828_v59 = vpop.f32.mrb[31].mxu0 }
 0x12c   : > { %v1892_v46 = vadd.s32 48, %v3668_v41 }
 0x12d   : > { %v881_v42 = vpop.f32.mrb[32].mxu1 }
 0x12e   : > { %v920_v60 = vadd.f32 %v881_v42, %v3629_v0  ;;  %v2799_v62 = vpop.f32.mrb[33].mxu1 }
 0x12f   : > { %v884_v63 = vpop.f32.mrb[34].mxu1 }
 0x130   : > { %v1078_v3 = vpop.f32.mrb[32].mxu0  ;;  %v1109_v4 = vadd.f32 %v1070_v51, %v920_v60  ;;  %v921_v58 = vadd.f32 %v884_v63, %v3638_v61  ;;  %v2800_v7 = vpop.f32.mrb[35].mxu1  ;;  %v1896_v60 = vadd.s32 1, %v3668_v41  ;;  %v1887_v63 = vadd.s32 8, %v3668_v41 }
 0x131   : > { %v2831_v10 = vpop.f32.mrb[33].mxu0 }
 0x132   : > { %v1081_v11 = vpop.f32.mrb[34].mxu0  ;;  %v1110_v12 = vadd.f32 %v1073_v55, %v921_v58 }
 0x133   : > { %v2832_v13 = vpop.f32.mrb[35].mxu0 }
 0x135   : > { %v889_v49 = vpop.f32.mrb[36].mxu1 }
 0x136   : > { %v922_v16 = vadd.f32 %v889_v49, %v741_v21  ;;  %v2803_v17 = vpop.f32.mrb[37].mxu1 }
 0x137   : > { %v892_v19 = vpop.f32.mrb[38].mxu1  ;;  %v1888_v17 = vadd.s32 16, %v3668_v41 }
 0x138   : > { %v1086_v20 = vpop.f32.mrb[36].mxu0  ;;  %v3656_v22 = vadd.f32 %v1078_v3, %v922_v16  ;;  %v923_v23 = vadd.f32 %v892_v19, %v742_v25  ;;  %v2804_v0 = vpop.f32.mrb[39].mxu1 }
 0x139   : > { %v2835_v2 = vpop.f32.mrb[37].mxu0 }
 0x13a   : > { %v1089_v24 = vpop.f32.mrb[38].mxu0  ;;  %v3658_v5 = vadd.f32 %v1081_v11, %v923_v23  ;;  %v3676_v10 = vmul.u32.u64.low 3435973837, %v1896_v60  ;;  %v3677_v11 = vmul.u32.u64.high 3435973837, %v1896_v60, %v3676_v10  ;;  %v3687_v2 = vadd.s32 1, %v1888_v17 }
 0x13b   : > { %v2836_v15 = vpop.f32.mrb[39].mxu0 }
 0x13d   : > { %v897_v61 = vpop.f32.mrb[40].mxu1 }
 0x13e   : > { %v924_v26 = vadd.f32 %v897_v61, %v743_v30  ;;  %v2807_v8 = vpop.f32.mrb[41].mxu1 }
 0x13f   : > { %v900_v18 = vpop.f32.mrb[42].mxu1 }
 0x140   : > { %v1094_v27 = vpop.f32.mrb[40].mxu0  ;;  %v3660_v29 = vadd.f32 %v1086_v20, %v924_v26  ;;  %v925_v21 = vadd.f32 %v900_v18, %v744_v28  ;;  %v2808_v31 = vpop.f32.mrb[43].mxu1  ;;  %v3682_v20 = vadd.s32 1, %v1887_v63  ;;  %v2620_v63 = vld [vmem:[%s3715_s10 + $0x8] sm:$0xff]  }
 0x141   : > { %v2839_v32 = vpop.f32.mrb[41].mxu0  ;;  %v2607_v17 = vunpack.c.h.bf16 %v2620_v63 }
 0x142   : > { %v1097_v33 = vpop.f32.mrb[42].mxu0  ;;  %v3662_v6 = vadd.f32 %v1089_v24, %v925_v21  ;;  %v3690_v15 = vmul.u32.u64.low 3435973837, %v3682_v20  ;;  %v3691_v61 = vmul.u32.u64.high 3435973837, %v3682_v20, %v3690_v15  ;;  %v1912_v21 = vshrl.u32 %v3677_v11, 3 }
 0x143   : > { %v2840_v25 = vpop.f32.mrb[43].mxu0 }
 0x145   : > { %v905_v34 = vpop.f32.mrb[44].mxu1 }
 0x146   : > { %v926_v36 = vadd.f32 %v905_v34, %v745_v14  ;;  %v2811_v38 = vpop.f32.mrb[45].mxu1 }
 0x147   : > { %v908_v39 = vpop.f32.mrb[46].mxu1 }
 0x148   : > { %v1102_v40 = vpop.f32.mrb[44].mxu0  ;;  %v3664_v57 = vadd.f32 %v1094_v27, %v926_v36  ;;  %v927_v30 = vadd.f32 %v908_v39, %v746_v45  ;;  %v2812_v35 = vpop.f32.mrb[47].mxu1  ;;  %v3701_v34 = vmul.u32.u64.low 3435973837, %v3687_v2  ;;  %v3702_v36 = vmul.u32.u64.high 3435973837, %v3687_v2, %v3701_v34 }
 0x149   : > { %v2843_v1 = vpop.f32.mrb[45].mxu0  ;;  %v1890_v35 = vadd.s32 32, %v3668_v41 }
 0x14a   : > { %v1105_v43 = vpop.f32.mrb[46].mxu0  ;;  %v3666_v44 = vadd.f32 %v1097_v33, %v927_v30  ;;  %v1913_v1 = vmul.u32 10, %v1912_v21 }
 0x14b   : > { %v2844_v28 = vpop.f32.mrb[47].mxu0 }
 0x14c   : > { %v1923_v28 = vshrl.u32 %v3691_v61, 3 }
 0x14d   : > { %v913_v37 = vpop.f32.mrb[48].mxu1 }
 0x14e   : > { %v928_v47 = vadd.f32 %v913_v37, %v747_v52  ;;  %v2815_v48 = vpop.f32.mrb[49].mxu1 }
 0x14f   : > { %v916_v50 = vpop.f32.mrb[50].mxu1  ;;  %v3721_v48 = vadd.s32 1, %v1890_v35 }
 0x150   : > { %v1398_v51 = vpop.f32.mrb[48].mxu0  ;;  %v3670_v14 = vadd.f32 %v1102_v40, %v928_v47  ;;  %v929_v53 = vadd.f32 %v916_v50, %v748_v56  ;;  %v2816_v54 = vpop.f32.mrb[51].mxu1 }
 0x151   : > { %v2883_v55 = vpop.f32.mrb[49].mxu0  ;;  %v1914_v54 = vsub.s32 %v1896_v60, %v1913_v1 }
 0x152   : > { %v1401_v45 = vpop.f32.mrb[50].mxu0  ;;  %v3672_v59 = vadd.f32 %v1105_v43, %v929_v53  ;;  %v1800_v53 = vld [vmem:[%s3715_s10 + $0x4] sm:$0xe] }
 0x153   : > { %v2884_v42 = vpop.f32.mrb[51].mxu0  ;;  %vm2016_vm12 = vcmp.ne.s32.totalorder %v1914_v54, 0  ;;  %vm2026_vm13 = vcmp.lt.s32.totalorder %v1914_v54, 0  ;;  %v2046_v61 = vadd.s32 10, %v1914_v54 }
 0x154   : > { %vm3751_vm14 = vmand %vm2026_vm13, %vm2016_vm12 }
 0x155   : > { %v1217_v62 = vpop.f32.mrb[52].mxu1 }
 0x156   : > { %v1256_v52 = vadd.f32 %v1217_v62, %v1109_v4  ;;  %v2855_v3 = vpop.f32.mrb[53].mxu1  ;;  %v1889_v4 = vadd.s32 24, %v3668_v41 }
 0x157   : > { %v1220_v58 = vpop.f32.mrb[54].mxu1 }
 0x158   : > { %v1406_v7 = vpop.f32.mrb[52].mxu0  ;;  %v3679_v13 = vadd.f32 %v1398_v51, %v1256_v52  ;;  %v1257_v56 = vadd.f32 %v1220_v58, %v1110_v12  ;;  %v2856_v49 = vpop.f32.mrb[55].mxu1  ;;  %v3694_v8 = vadd.s32 1, %v1889_v4  ;;  %v1934_v52 = vshrl.u32 %v3702_v36, 3 }
 0x159   : > { %v2887_v16 = vpop.f32.mrb[53].mxu0  ;;  %v1924_v58 = vmul.u32 10, %v1923_v28  ;;  %v2606_v49 = vunpack.c.l.bf16 %v2620_v63 }
 0x15a   : > { %v1409_v19 = vpop.f32.mrb[54].mxu0  ;;  %v3684_v23 = vadd.f32 %v1401_v45, %v1257_v56  ;;  %v3707_v40 = vmul.u32.u64.low 3435973837, %v3694_v8  ;;  %v3708_v30 = vmul.u32.u64.high 3435973837, %v3694_v8, %v3707_v40  ;;  %v1811_v16 = vunpack.c.l.bf16 %v1800_v53 }
 0x15b   : > { %v2888_v0 = vpop.f32.mrb[55].mxu0  ;;  %v1894_v40 = vadd.s32 64, %v3668_v41 }
 0x15c   : > { %v1945_v60 = vshrl.u32 %v3708_v30, 3  ;;  %v1935_v0 = vmul.u32 10, %v1934_v52 }
 0x15d   : > { %v1225_v24 = vpop.f32.mrb[56].mxu1 }
 0x15e   : > { %v1258_v12 = vadd.f32 %v1225_v24, %v3656_v22  ;;  %v2859_v26 = vpop.f32.mrb[57].mxu1 }
 0x15f   : > { %v1228_v18 = vpop.f32.mrb[58].mxu1 }
 0x160   : > { %v1414_v27 = vpop.f32.mrb[56].mxu0  ;;  %v3697_v31 = vadd.f32 %v1406_v7, %v1258_v12  ;;  %v1259_v32 = vadd.f32 %v1228_v18, %v3658_v5  ;;  %v2860_v33 = vpop.f32.mrb[59].mxu1  ;;  %v1891_v5 = vadd.s32 40, %v3668_v41  ;;  %v3731_v7 = vadd.s32 1, %v1892_v46 }
 0x161   : > { %v2891_v25 = vpop.f32.mrb[57].mxu0  ;;  %v1893_v18 = vadd.s32 56, %v3668_v41  ;;  %v1925_v33 = vsub.s32 %v3682_v20, %v1924_v58  ;;  %v1835_v46 = vrot.slane %v2606_v49, 3  ;;  %v3765_v20 = vsel %vm3751_vm14, %v2046_v61, %v1914_v54 }
 0x162   : > { %v1417_v38 = vpop.f32.mrb[58].mxu0  ;;  %v3704_v22 = vadd.f32 %v1409_v19, %v1259_v32  ;;  %v3729_v3 = vadd.s32 1, %v1891_v5  ;;  %v2621_v19 = vld [vmem:[%s3715_s10 + $0x10] sm:$0xff]   ;;  %v3746_v12 = vmul.u32.u64.low 3435973837, %v3731_v7  ;;  %v3747_v26 = vmul.u32.u64.high 3435973837, %v3731_v7, %v3746_v12 }
 0x163   : > { %v2892_v39 = vpop.f32.mrb[59].mxu0  ;;  %v1946_v25 = vmul.u32 10, %v1945_v60  ;;  %v3761_v5 = vsub.s32 %v3687_v2, %v1935_v0  ;;  %vm2017_vm15 = vcmp.ne.s32.totalorder %v1925_v33, 0  ;;  %vm2027_vm0 = vcmp.lt.s32.totalorder %v1925_v33, 0  ;;  %v2623_v0 = vld [vmem:[%s3715_s10 + $0x20] sm:$0xff]  }
 0x164   : > { %v3742_v4 = vmul.u32.u64.low 3435973837, %v3729_v3  ;;  %v3743_v24 = vmul.u32.u64.high 3435973837, %v3729_v3, %v3742_v4  ;;  %v2610_v39 = vunpack.c.l.bf16 %v2621_v19  ;;  %v2047_v53 = vadd.s32 10, %v1925_v33  ;;  %vm3790_vm3 = vmand %vm2027_vm0, %vm2017_vm15 }
 0x165   : > { %v1233_v43 = vpop.f32.mrb[60].mxu1  ;;  %vm2018_vm1 = vcmp.ne.s32.totalorder %v3761_v5, 0  ;;  %vm2028_vm2 = vcmp.lt.s32.totalorder %v3761_v5, 0  ;;  %vm2066_vm12 = vcmp.ge.s32.totalorder %v3765_v20, 1  ;;  %vm2076_vm13 = vcmp.le.s32.totalorder %v3765_v20, 8 }
 0x166   : > { %v1260_v37 = vadd.f32 %v1233_v43, %v3660_v29  ;;  %v2863_v47 = vpop.f32.mrb[61].mxu1  ;;  %v2611_v43 = vunpack.c.h.bf16 %v2621_v19  ;;  %v1967_v63 = vshrl.u32 %v3743_v24, 3  ;;  %vm3807_vm7 = vmand %vm2028_vm2, %vm2018_vm1 }
 0x167   : > { %v1236_v50 = vpop.f32.mrb[62].mxu1  ;;  %v3767_v47 = vadd.s32 1, %v1893_v18 }
 0x168   : > { %v1422_v51 = vpop.f32.mrb[60].mxu0  ;;  %v3724_v55 = vadd.f32 %v1414_v27, %v1260_v37  ;;  %v1261_v45 = vadd.f32 %v1236_v50, %v3662_v6  ;;  %v2864_v42 = vpop.f32.mrb[63].mxu1  ;;  %v3737_v56 = vmul.u32.u64.low 3435973837, %v3721_v48  ;;  %v3738_v6 = vmul.u32.u64.high 3435973837, %v3721_v48, %v3737_v56 }
 0x169   : > { %v2895_v62 = vpop.f32.mrb[61].mxu0  ;;  %v1837_v37 = vrot.slane %v2607_v17, 3  ;;  %v3773_v42 = vadd.s32 1, %v1894_v40  ;;  %v3777_v54 = vrot.slane %v2611_v43, 3 }
 0x16a   : > { %v1425_v29 = vpop.f32.mrb[62].mxu0  ;;  %v3733_v10 = vadd.f32 %v1417_v38, %v1261_v45  ;;  %v1834_v38 = vrot.slane %v1811_v16, 3  ;;  %v1956_v2 = vshrl.u32 %v3738_v6, 3  ;;  %v1839_v45 = vrot.slane %v2610_v39, 3  ;;  %v2622_v62 = vld [vmem:[%s3715_s10 + $0x18] sm:$0xff]  }
 0x16b   : > { %v2896_v11 = vpop.f32.mrb[63].mxu0  ;;  %v2614_v19 = vunpack.c.l.bf16 %v2622_v62  ;;  %v3796_v4 = vmul.u32.u64.low 3435973837, %v3773_v42  ;;  %v3797_v24 = vmul.u32.u64.high 3435973837, %v3773_v42, %v3796_v4 }
 0x16c   : > { %v3784_v58 = vmul.u32.u64.low 3435973837, %v3767_v47  ;;  %v3785_v11 = vmul.u32.u64.high 3435973837, %v3767_v47, %v3784_v58  ;;  %v1957_v49 = vmul.u32 10, %v1956_v2  ;;  %v3812_v32 = vsel %vm4188_vm6, %v1834_v38, %v1835_v46 }
 0x16d   : > { %v1241_v15 = vpop.f32.mrb[64].mxu1 }
 0x16e   : > { %v1262_v27 = vadd.f32 %v1241_v15, %v3664_v57  ;;  %v2867_v21 = vpop.f32.mrb[65].mxu1  ;;  %v3829_v40 = vsub.s32 %v3721_v48, %v1957_v49  ;;  %v1809_v49 = vld [vmem:[%s3715_s10 + $0x28] sm:$0xf] }
 0x16f   : > { %v1244_v34 = vpop.f32.mrb[66].mxu1  ;;  %v1968_v21 = vmul.u32 10, %v1967_v63 }
 0x170   : > { %v1430_v36 = vpop.f32.mrb[64].mxu0  ;;  %v3757_v30 = vadd.f32 %v1422_v51, %v1262_v27  ;;  %v1263_v35 = vadd.f32 %v1244_v34, %v3666_v44  ;;  %v2868_v1 = vpop.f32.mrb[67].mxu1  ;;  %v1947_v44 = vsub.s32 %v3694_v8, %v1946_v25  ;;  %v2048_v8 = vadd.s32 10, %v3761_v5 }
 0x171   : > { %v2899_v57 = vpop.f32.mrb[65].mxu0  ;;  %v3816_v25 = vsel %vm3790_vm3, %v2047_v53, %v1925_v33  ;;  %v2615_v34 = vunpack.c.h.bf16 %v2622_v62  ;;  %v2618_v33 = vunpack.c.l.bf16 %v2623_v0  ;;  %v3835_v1 = vsel %vm4188_vm6, %v1837_v37, %v1839_v45 }
 0x172   : > { %v1433_v28 = vpop.f32.mrb[66].mxu0  ;;  %v3769_v50 = vadd.f32 %v1425_v29, %v1263_v35  ;;  %v1978_v29 = vshrl.u32 %v3747_v26, 3  ;;  %vm2019_vm4 = vcmp.ne.s32.totalorder %v1947_v44, 0  ;;  %vm2029_vm5 = vcmp.lt.s32.totalorder %v1947_v44, 0 }
 0x173   : > { %v2900_v51 = vpop.f32.mrb[67].mxu0  ;;  %v2049_v27 = vadd.s32 10, %v1947_v44  ;;  %vm3820_vm8 = vmand %vm2029_vm5, %vm2019_vm4  ;;  %v3832_v35 = vsel %vm4188_vm6, %v1835_v46, %v1837_v37  ;;  %v3839_v57 = vsel %vm4188_vm6, %v1839_v45, %v3777_v54  ;;  %v3848_v48 = vsel %vm3807_vm7, %v2048_v8, %v3761_v5  ;;  %v3863_v5 = vld [vmem:[%s4183_s2] ss:$0 sm:$0xff] }
 0x174   : > { %v1843_v46 = vrot.slane %v2614_v19, 3  ;;  %v1969_v37 = vsub.s32 %v3729_v3, %v1968_v21  ;;  %v1845_v2 = vrot.slane %v2615_v34, 3  ;;  %v2619_v45 = vunpack.c.h.bf16 %v2623_v0 }
 0x175   : > { %v1249_v52 = vpop.f32.mrb[68].mxu1  ;;  %v1989_v62 = vshrl.u32 %v3785_v11, 3  ;;  %vm2020_vm0 = vcmp.ne.s32.totalorder %v3829_v40, 0  ;;  %vm2030_vm1 = vcmp.lt.s32.totalorder %v3829_v40, 0  ;;  %v1847_v3 = vrot.slane %v2618_v33, 3 }
 0x176   : > { %v1264_v60 = vadd.f32 %v1249_v52, %v3670_v14  ;;  %v2871_v56 = vpop.f32.mrb[69].mxu1  ;;  %v1895_v14 = vadd.s32 72, %v3668_v41  ;;  %v2050_v8 = vadd.s32 10, %v3829_v40  ;;  %vm2021_vm2 = vcmp.ne.s32.totalorder %v1969_v37, 0  ;;  %vm3885_vm11 = vmand %vm2030_vm1, %vm2020_vm0 }
 0x177   : > { %v1252_v16 = vpop.f32.mrb[70].mxu1  ;;  %vm2031_vm3 = vcmp.lt.s32.totalorder %v1969_v37, 0  ;;  %v3877_v19 = vrot.slane %v2619_v45, 3  ;;  %v1990_v0 = vmul.u32 10, %v1989_v62  ;;  %vm2257_vm4 = vsmask.f32 7942 }
 0x178   : > { %v1734_v17 = vpop.f32.mrb[68].mxu0  ;;  %v3800_v15 = vadd.f32 %v1430_v36, %v1264_v60  ;;  %v1265_v61 = vadd.f32 %v1252_v16, %v3672_v59  ;;  %v2872_v12 = vpop.f32.mrb[71].mxu1  ;;  %v1979_v36 = vmul.u32 10, %v1978_v29  ;;  %v3841_v43 = vadd.s32 1, %v1895_v14  ;;  %vm3892_vm15 = vmand %vm2031_vm3, %vm2021_vm2 }
 0x179   : > { %v2939_v26 = vpop.f32.mrb[69].mxu0  ;;  %v2000_v29 = vshrl.u32 %v3797_v24, 3  ;;  %v2051_v14 = vadd.s32 10, %v1969_v37  ;;  %vm2078_vm14 = vcmp.le.s32.totalorder %v3848_v48, 8  ;;  %v3906_v59 = vsel %vm4188_vm6, %v1843_v46, %v1845_v2  ;;  %vm3920_vm3 = vmand %vm2066_vm12, %vm2076_vm13 }
 0x17a   : > { %v1737_v41 = vpop.f32.mrb[70].mxu0  ;;  %v3824_v39 = vadd.f32 %v1433_v28, %v1265_v61  ;;  %v3852_v28 = vsel %vm3820_vm8, %v2049_v27, %v1947_v44  ;;  %v3856_v53 = vsub.s32 %v3731_v7, %v1979_v36  ;;  %vm2068_vm8 = vcmp.ge.s32.totalorder %v3848_v48, 1 }
 0x17b   : > { %v2940_v38 = vpop.f32.mrb[71].mxu0  ;;  %v1820_v26 = vunpack.c.l.bf16 %v1809_v49  ;;  %v2001_v18 = vmul.u32 10, %v2000_v29  ;;  %vm2069_vm0 = vcmp.ge.s32.totalorder %v3852_v28, 1  ;;  %vm2079_vm1 = vcmp.le.s32.totalorder %v3852_v28, 8 }
 0x17c   : > { %vm2022_vm5 = vcmp.ne.s32.totalorder %v3856_v53, 0  ;;  %vm2032_vm7 = vcmp.lt.s32.totalorder %v3856_v53, 0  ;;  %v2052_v12 = vadd.s32 10, %v3856_v53  ;;  %v3927_v36 = vsel %vm3885_vm11, %v2050_v8, %v3829_v40 }
 0x17d   : > { %v1587_v51 = vpop.f32.mrb[72].mxu1  ;;  %vm3912_vm2 = vmand %vm2032_vm7, %vm2022_vm5  ;;  %v3930_v38 = vsel %vm4188_vm6, %v1845_v2, %v1847_v3  ;;  %v3934_v33 = vsel %vm4188_vm6, %v1847_v3, %v3877_v19  ;;  %v3943_v40 = vsel %vm3892_vm15, %v2051_v14, %v1969_v37  ;;  %vm4207_vm11 = vcmp.le.s32.totalorder %v3816_v25, 8 }
 0x17e   : > { %v1626_v63 = vadd.f32 %v1587_v51, %v3679_v13  ;;  %v2911_v44 = vpop.f32.mrb[73].mxu1  ;;  %v3870_v13 = vmul.u32.u64.low 3435973837, %v3841_v43  ;;  %v3871_v58 = vmul.u32.u64.high 3435973837, %v3841_v43, %v3870_v13  ;;  %vm4208_vm12 = vcmp.ge.s32.totalorder %v3816_v25, 1 }
 0x17f   : > { %v1590_v52 = vpop.f32.mrb[74].mxu1  ;;  %vm3952_vm13 = vmand %vm4208_vm12, %vm4207_vm11  ;;  %v3964_v37 = vsub.s32 %v3773_v42, %v2001_v18  ;;  %vm4212_vm11 = vsmask.f32 1280  ;;  %vm2081_vm7 = vcmp.le.s32.totalorder %v3943_v40, 8 }
 0x180   : > { %v1742_v7 = vpop.f32.mrb[72].mxu0  ;;  %v1773_v11 = vadd.f32 %v1734_v17, %v1626_v63  ;;  %v1627_v60 = vadd.f32 %v1590_v52, %v3684_v23  ;;  %v2912_v56 = vpop.f32.mrb[75].mxu1  ;;  %v3946_v63 = vld [vmem:[%s3715_s10 + $0x2c] sm:$0x3]  ;;  %v2011_v3 = vshrl.u32 %v3871_v58, 3 }
 0x181   : > { %v2943_v6 = vpop.f32.mrb[73].mxu0  ;;  %v1821_v42 = vunpack.c.l.bf16 %v3946_v63  ;;  %v2054_v48 = vadd.s32 10, %v3964_v37 }
 0x182   : > { %v1745_v16 = vpop.f32.mrb[74].mxu0  ;;  %v1790_v4 = vadd.f32 %v3863_v5, %v1773_v11  ;;  %v1774_v24 = vadd.f32 %v1737_v41, %v1627_v60  ;;  %v3903_v41 = vsel %vm4188_vm6, %v3777_v54, %v1843_v46  ;;  %v3937_v46 = vsub.s32 %v3767_v47, %v1990_v0 }
 0x183   : > { %v2944_v23 = vpop.f32.mrb[75].mxu0  ;;  %vm2034_vm6 = vcmp.lt.s32.totalorder %v3964_v37, 0 }
 0x184   : > { %v1865_v27 = vadd.f32 %v3812_v32, %v1790_v4  ;;  %v1791_v21 = vadd.f32 %v3863_v5, %v1774_v24  ;;  %vm2023_vm15 = vcmp.ne.s32.totalorder %v3937_v46, 0  ;;  %vm2033_vm5 = vcmp.lt.s32.totalorder %v3937_v46, 0 }
 0x185   : > { %v1595_v54 = vpop.f32.mrb[76].mxu1  ;;  %v2012_v24 = vmul.u32 10, %v2011_v3 }
 0x186   : > { %v1875_v20 = vmax.f32 %v1865_v27, 0.0  ;;  %v1866_v51 = vadd.f32 %v3832_v35, %v1791_v21  ;;  %v1628_v45 = vadd.f32 %v1595_v54, %v3697_v31  ;;  %v2915_v62 = vpop.f32.mrb[77].mxu1  ;;  %v3959_v31 = vsel %vm3912_vm2, %v2052_v12, %v3856_v53  ;;  %v2259_v21 = vld [vmem:[%s3626_s7 + $0x4] sm:$0xe] }
 0x187   : > { %v1598_v47 = vpop.f32.mrb[78].mxu1  ;;  %v3961_v35 = vrot.slane %v1820_v26, 3  ;;  %vm2024_vm2 = vcmp.ne.s32.totalorder %v3964_v37, 0 }
 0x188   : > { %v1750_v44 = vpop.f32.mrb[76].mxu0  ;;  %v2096_v25 = vsel %vm3920_vm3, %v1875_v20, 0.0  ;;  %v1876_v52 = vmax.f32 %v1866_v51, 0.0  ;;  %v1775_v8 = vadd.f32 %v1742_v7, %v1628_v45  ;;  %v1629_v29 = vadd.f32 %v1598_v47, %v3704_v22  ;;  %v2916_v13 = vpop.f32.mrb[79].mxu1 }
 0x189   : > { %v2947_v11 = vpop.f32.mrb[77].mxu0  ;;  %v2594_v60 = vpack.c.bf16 %v2096_v25, %v2096_v25  ;;  %v2053_v7 = vadd.s32 10, %v3937_v46  ;;  %vm4211_vm3 = vsmask.f32 5392 }
 0x18a   : > { %v1753_v56 = vpop.f32.mrb[78].mxu0  ;;  %v2097_v53 = vsel %vm3952_vm13, %v1876_v52, 0.0  ;;  %v1792_v58 = vadd.f32 %v3863_v5, %v1775_v8  ;;  %v1776_v6 = vadd.f32 %v1745_v16, %v1629_v29  ;;  %vm3981_vm12 = vmor %vm4212_vm11, %vm4211_vm3  ;;  %vm2071_vm13 = vcmp.ge.s32.totalorder %v3943_v40, 1 }
 0x18b   : > { %v2948_v22 = vpop.f32.mrb[79].mxu0  ;;  %v2147_v49 = vshrl.u32 %v2594_v60, 16  ;;  %v2150_v0 = vshll.u32 %v2594_v60, 16  ;;  %v2595_v4 = vpack.c.bf16 %v2097_v53, %v2097_v53  ;;  %vm3995_vm3 = vmand %vm2068_vm8, %vm2078_vm14 }
 0x18c   : > { %v1867_v16 = vadd.f32 %v3835_v1, %v1792_v58  ;;  %v1793_v17 = vadd.f32 %v3863_v5, %v1776_v6  ;;  %vm4001_vm11 = vmand %vm2256_vm9, %vm2257_vm4  ;;  %vm4223_vm4 = vcmask 1044480  }
 0x18d   : > { %v2149_v14 = vrot.slane %v2147_v49, 6  ;;  %v2152_v61 = vrot.slane %v2150_v0, 7  ;;  %v2156_v12 = vshrl.u32 %v2595_v4, 16  ;;  %v2159_v26 = vshll.u32 %v2595_v4, 16  ;;  %v1603_v18 = vpop.f32.mrb[80].mxu1  ;;  %vm4013_vm9 = vmand %vm2069_vm0, %vm2079_vm1 }
 0x18e   : > { %v1877_v32 = vmax.f32 %v1867_v16, 0.0  ;;  %v1868_v34 = vadd.f32 %v3839_v57, %v1793_v17  ;;  %v1630_v54 = vadd.f32 %v1603_v18, %v3724_v55  ;;  %v2919_v20 = vpop.f32.mrb[81].mxu1  ;;  %v4018_v57 = vsub.s32 %v3841_v43, %v2012_v24  ;;  %vm4027_vm14 = vmand %vm2033_vm5, %vm2023_vm15 }
 0x18f   : > { %v2153_v51 = vor.u32 %v2152_v61, %v2149_v14  ;;  %v2158_v45 = vrot.slane %v2156_v12, 6  ;;  %v2161_v62 = vrot.slane %v2159_v26, 7  ;;  %v1606_v47 = vpop.f32.mrb[82].mxu1  ;;  %v4040_v49 = vsel %vm4223_vm4, %v3877_v19, %v3961_v35  ;;  %vm4046_vm8 = vmand %vm2034_vm6, %vm2024_vm2 }
 0x190   : > { %v1758_v3 = vpop.f32.mrb[80].mxu0  ;;  %v2098_v55 = vsel %vm3995_vm3, %v1877_v32, 0.0  ;;  %v1878_v25 = vmax.f32 %v1868_v34, 0.0  ;;  %v1777_v52 = vadd.f32 %v1750_v44, %v1630_v54  ;;  %v1631_v8 = vadd.f32 %v1606_v47, %v3733_v10  ;;  %v2920_v29 = vpop.f32.mrb[83].mxu1 }
 0x191   : > { %v2951_v13 = vpop.f32.mrb[81].mxu0  ;;  %v2154_v11 = vrot.slane %v2153_v51, 4  ;;  %v2260_v43 = vsel %vm4001_vm11, %v2153_v51, %v2259_v21  ;;  %v2162_v60 = vor.u32 %v2161_v62, %v2158_v45  ;;  %v2596_v53 = vpack.c.bf16 %v2098_v55, %v2098_v55 }
 0x192   : > { %v1761_v44 = vpop.f32.mrb[82].mxu0  ;;  %2261 = vst [vmem:[%s3626_s7 + $0x4] sm:$0xe] %v2260_v43  ;;  %v2099_v10 = vsel %vm4013_vm9, %v1878_v25, 0.0  ;;  %v1794_v58 = vadd.f32 %v3863_v5, %v1777_v52  ;;  %v1778_v6 = vadd.f32 %v1753_v56, %v1631_v8  ;;  %v4055_v56 = vsel %vm4027_vm14, %v2053_v7, %v3937_v46  ;;  %vm4087_vm14 = vmand %vm2071_vm13, %vm2081_vm7 }
 0x193   : > { %v2952_v22 = vpop.f32.mrb[83].mxu0  ;;  %v2163_v4 = vsel %vm3981_vm12, %v2154_v11, %v2162_v60  ;;  %v2166_v24 = vshrl.u32 %v2596_v53, 16  ;;  %v2169_v16 = vshll.u32 %v2596_v53, 16  ;;  %vm4226_vm0 = vcmask 519168  }
 0x194   : > { %2262 = vst.msk [vmem:[%s3626_s7 + $0x8] sm:$0xf] %vm4226_vm0, %v2163_v4  ;;  %v2597_v19 = vpack.c.bf16 %v2099_v10, %v2099_v10  ;;  %v1869_v17 = vadd.f32 %v3903_v41, %v1794_v58  ;;  %v1795_v14 = vadd.f32 %v3863_v5, %v1778_v6  ;;  %vm2072_vm6 = vcmp.ge.s32.totalorder %v3959_v31, 1  ;;  %vm4233_vm7 = vmmov %vm4226_vm0 }
 0x195   : > { %vm2082_vm1 = vcmp.le.s32.totalorder %v3959_v31, 8  ;;  %v4065_v61 = vrot.slane %v1821_v42, 3  ;;  %v2168_v12 = vrot.slane %v2166_v24, 6  ;;  %v2171_v26 = vrot.slane %v2169_v16, 7  ;;  %v1611_v41 = vpop.f32.mrb[84].mxu1 }
 0x196   : > { %vm4227_vm15 = vcmp.le.s32.totalorder %v3927_v36, 8  ;;  %vm4228_vm5 = vcmp.ge.s32.totalorder %v3927_v36, 1  ;;  %v4078_v7 = vsel %vm4046_vm8, %v2054_v48, %v3964_v37  ;;  %vm2025_vm3 = vcmp.ne.s32.totalorder %v4018_v57, 0  ;;  %v2923_v21 = vpop.f32.mrb[85].mxu1 }
 0x197   : > { %vm4071_vm2 = vmand %vm4228_vm5, %vm4227_vm15  ;;  %v2176_v63 = vshrl.u32 %v2597_v19, 16  ;;  %v2179_v42 = vshll.u32 %v2597_v19, 16  ;;  %v1879_v1 = vmax.f32 %v1869_v17, 0.0  ;;  %v1870_v18 = vadd.f32 %v3906_v59, %v1795_v14  ;;  %v1614_v54 = vpop.f32.mrb[86].mxu1 }
 0x198   : > { %vm2073_vm9 = vcmp.ge.s32.totalorder %v4055_v56, 1  ;;  %v2164_v36 = vrot.slane %v2162_v60, 4  ;;  %v2172_v32 = vor.u32 %v2171_v26, %v2168_v12  ;;  %v1632_v37 = vadd.f32 %v1611_v41, %v3757_v30  ;;  %v1766_v20 = vpop.f32.mrb[84].mxu0  ;;  %v2924_v62 = vpop.f32.mrb[87].mxu1  ;;  %vm4234_vm15 = vmmov %vm4233_vm7 }
 0x199   : > { %vm2035_vm4 = vcmp.lt.s32.totalorder %v4018_v57, 0  ;;  %v2178_v59 = vrot.slane %v2176_v63, 6  ;;  %v2181_v48 = vrot.slane %v2179_v42, 7  ;;  %v2100_v51 = vsel %vm4071_vm2, %v1879_v1, 0.0  ;;  %v2955_v2 = vpop.f32.mrb[85].mxu0  ;;  %vm2092_vm5 = vmand %vm2072_vm6, %vm2082_vm1 }
 0x19a   : > { %v1880_v45 = vmax.f32 %v1870_v18, 0.0  ;;  %v2173_v40 = vsel %vm3981_vm12, %v2164_v36, %v2172_v32  ;;  %v2174_v47 = vrot.slane %v2172_v32, 4  ;;  %v2598_v55 = vpack.c.bf16 %v2100_v51, %v2100_v51  ;;  %v1769_v52 = vpop.f32.mrb[86].mxu0  ;;  %vm2045_vm13 = vmand %vm2035_vm4, %vm2025_vm3 }
 0x19b   : > { %v1779_v25 = vadd.f32 %v1758_v3, %v1632_v37  ;;  %2263 = vst.msk [vmem:[%s3626_s7 + $0xc] sm:$0xf] %vm4233_vm7, %v2173_v40  ;;  %v2182_v30 = vor.u32 %v2181_v48, %v2178_v59  ;;  %v1633_v29 = vadd.f32 %v1614_v54, %v3769_v50  ;;  %v2055_v13 = vadd.s32 10, %v4018_v57  ;;  %v2956_v28 = vpop.f32.mrb[87].mxu0  ;;  %vm4235_vm1 = vmmov %vm4233_vm7 }
 0x19c   : > { %v2101_v8 = vsel %vm4087_vm14, %v1880_v45, 0.0  ;;  %v2186_v11 = vshrl.u32 %v2598_v55, 16  ;;  %v2189_v43 = vshll.u32 %v2598_v55, 16  ;;  %vm2083_vm8 = vcmp.le.s32.totalorder %v4055_v56, 8  ;;  %vm4237_vm4 = vmmov %vm4235_vm1 }
 0x19d   : > { %v2599_v60 = vpack.c.bf16 %v2101_v8, %v2101_v8  ;;  %v1796_v53 = vadd.f32 %v3863_v5, %v1779_v25  ;;  %v2183_v3 = vsel %vm3981_vm12, %v2174_v47, %v2182_v30  ;;  %v1780_v10 = vadd.f32 %v1761_v44, %v1633_v29  ;;  %v1619_v0 = vpop.f32.mrb[88].mxu1  ;;  %vm2093_vm2 = vmand %vm2073_vm9, %vm2083_vm8 }
 0x19e   : > { %vm2074_vm0 = vcmp.ge.s32.totalorder %v4078_v7, 1  ;;  %2264 = vst.msk [vmem:[%s3626_s7 + $0x10] sm:$0xf] %vm4234_vm15, %v2183_v3  ;;  %v2188_v50 = vrot.slane %v2186_v11, 6  ;;  %v2191_v58 = vrot.slane %v2189_v43, 7  ;;  %v1634_v16 = vadd.f32 %v1619_v0, %v3800_v15  ;;  %v2927_v19 = vpop.f32.mrb[89].mxu1  ;;  %vm4238_vm8 = vmmov %vm4235_vm1 }
 0x19f   : > { %v2196_v6 = vshrl.u32 %v2599_v60, 16  ;;  %v2199_v22 = vshll.u32 %v2599_v60, 16  ;;  %v1871_v4 = vadd.f32 %v3930_v38, %v1796_v53  ;;  %v1797_v24 = vadd.f32 %v3863_v5, %v1780_v10  ;;  %v1622_v46 = vpop.f32.mrb[90].mxu1 }
 0x1a0   : > { %v2065_v44 = vsel %vm2045_vm13, %v2055_v13, %v4018_v57  ;;  %v2184_v17 = vrot.slane %v2182_v30, 4  ;;  %v2192_v14 = vor.u32 %v2191_v58, %v2188_v50  ;;  %v1781_v63 = vadd.f32 %v1766_v20, %v1634_v16  ;;  %v2928_v42 = vpop.f32.mrb[91].mxu1  ;;  %v2271_v16 = vld [vmem:[%s3626_s7 + $0x2c] sm:$0x3] }
 0x1a1   : > { %v2198_v12 = vrot.slane %v2196_v6, 6  ;;  %v2201_v26 = vrot.slane %v2199_v22, 7  ;;  %v1881_v41 = vmax.f32 %v1871_v4, 0.0  ;;  %v1872_v38 = vadd.f32 %v3934_v33, %v1797_v24 }
 0x1a2   : > { %v1635_v15 = vadd.f32 %v1622_v46, %v3824_v39  ;;  %v2193_v57 = vsel %vm3981_vm12, %v2184_v17, %v2192_v14  ;;  %v2194_v1 = vrot.slane %v2192_v14, 4  ;;  %vm2084_vm6 = vcmp.le.s32.totalorder %v4078_v7, 8 }
 0x1a3   : > { %v2202_v18 = vor.u32 %v2201_v26, %v2198_v12  ;;  %2265 = vst.msk [vmem:[%s3626_s7 + $0x14] sm:$0xf] %vm4235_vm1, %v2193_v57  ;;  %v2102_v33 = vsel %vm2092_vm5, %v1881_v41, 0.0  ;;  %v1882_v31 = vmax.f32 %v1872_v38, 0.0  ;;  %v1798_v39 = vadd.f32 %v3863_v5, %v1781_v63  ;;  %vm2094_vm7 = vmand %vm2074_vm0, %vm2084_vm6 }
 0x1a4   : > { %v1782_v21 = vadd.f32 %v1769_v52, %v1635_v15  ;;  %v2600_v32 = vpack.c.bf16 %v2102_v33, %v2102_v33  ;;  %vm4236_vm3 = vcmask 1044480   ;;  %vm2075_vm14 = vcmp.ge.s32.totalorder %v2065_v44, 1  ;;  %vm4239_vm0 = vmmov %vm4235_vm1 }
 0x1a5   : > { %v2203_v36 = vsel %vm3981_vm12, %v2194_v1, %v2202_v18  ;;  %v1854_v34 = vsel %vm4236_vm3, %v3961_v35, %v4065_v61  ;;  %v2103_v56 = vsel %vm2093_vm2, %v1882_v31, 0.0  ;;  %v1873_v37 = vadd.f32 %v4040_v49, %v1798_v39  ;;  %vm4240_vm15 = vmmov %vm4239_vm0 }
 0x1a6   : > { %2266 = vst.msk [vmem:[%s3626_s7 + $0x18] sm:$0xf] %vm4237_vm4, %v2203_v36  ;;  %v1799_v54 = vadd.f32 %v3863_v5, %v1782_v21  ;;  %vm2085_vm9 = vcmp.le.s32.totalorder %v2065_v44, 8  ;;  %v2206_v20 = vshrl.u32 %v2600_v32, 16  ;;  %v2209_v59 = vshll.u32 %v2600_v32, 16  ;;  %vm4241_vm5 = vmmov %vm4239_vm0 }
 0x1a7   : > { %v2601_v48 = vpack.c.bf16 %v2103_v56, %v2103_v56  ;;  %v1883_v51 = vmax.f32 %v1873_v37, 0.0  ;;  %vm2095_vm13 = vmand %vm2075_vm14, %vm2085_vm9  ;;  %v2204_v49 = vrot.slane %v2202_v18, 4 }
 0x1a8   : > { %v1874_v45 = vadd.f32 %v1854_v34, %v1799_v54  ;;  %v2208_v35 = vrot.slane %v2206_v20, 6  ;;  %v2211_v61 = vrot.slane %v2209_v59, 7 }
 0x1a9   : > { %v2216_v62 = vshrl.u32 %v2601_v48, 16  ;;  %v2219_v2 = vshll.u32 %v2601_v48, 16  ;;  %v2104_v5 = vsel %vm2094_vm7, %v1883_v51, 0.0 }
 0x1aa   : > { %v1884_v40 = vmax.f32 %v1874_v45, 0.0  ;;  %v2212_v47 = vor.u32 %v2211_v61, %v2208_v35  ;;  %v2602_v52 = vpack.c.bf16 %v2104_v5, %v2104_v5 }
 0x1ab   : > { %v2218_v55 = vrot.slane %v2216_v62, 6  ;;  %v2221_v25 = vrot.slane %v2219_v2, 7 }
 0x1ac   : > { %v2105_v30 = vsel %vm2095_vm13, %v1884_v40, 0.0  ;;  %v2213_v7 = vsel %vm3981_vm12, %v2204_v49, %v2212_v47  ;;  %v2214_v8 = vrot.slane %v2212_v47, 4  ;;  %v2226_v13 = vshrl.u32 %v2602_v52, 16 }
 0x1ad   : > { %v2222_v29 = vor.u32 %v2221_v25, %v2218_v55  ;;  %2267 = vst.msk [vmem:[%s3626_s7 + $0x1c] sm:$0xf] %vm4238_vm8, %v2213_v7  ;;  %v2229_v28 = vshll.u32 %v2602_v52, 16  ;;  %v2603_v11 = vpack.c.bf16 %v2105_v30, %v2105_v30 }
 0x1ae   : > { %v2228_v60 = vrot.slane %v2226_v13, 6 }
 0x1af   : > { %v2223_v43 = vsel %vm3981_vm12, %v2214_v8, %v2222_v29  ;;  %v2231_v53 = vrot.slane %v2229_v28, 7  ;;  %v2236_v3 = vshrl.u32 %v2603_v11, 16  ;;  %v2239_v10 = vshll.u32 %v2603_v11, 16 }
 0x1b0   : > { %2268 = vst.msk [vmem:[%s3626_s7 + $0x20] sm:$0xf] %vm4239_vm0, %v2223_v43  ;;  %v2224_v50 = vrot.slane %v2222_v29, 4 }
 0x1b1   : > { %v2232_v58 = vor.u32 %v2231_v53, %v2228_v60  ;;  %v2238_v6 = vrot.slane %v2236_v3, 6  ;;  %v2241_v22 = vrot.slane %v2239_v10, 7 }
 0x1b3   : > { %v2233_v0 = vsel %vm3981_vm12, %v2224_v50, %v2232_v58  ;;  %v2234_v4 = vrot.slane %v2232_v58, 4  ;;  %v2242_v24 = vor.u32 %v2241_v22, %v2238_v6 }
 0x1b4   : > { %2269 = vst.msk [vmem:[%s3626_s7 + $0x24] sm:$0xf] %vm4240_vm15, %v2233_v0 }
 0x1b5   : > { %v2243_v19 = vsel %vm3981_vm12, %v2234_v4, %v2242_v24  ;;  %v2244_v44 = vrot.slane %v2242_v24, 4 }
 0x1b6   : > { %2270 = vst.msk [vmem:[%s3626_s7 + $0x28] sm:$0xf] %vm4241_vm5, %v2243_v19 }
 0x1b7   : > { %v2272_v17 = vsel %vm3632_vm10, %v2244_v44, %v2271_v16 }
 0x1b8   : > { %2273 = vst [vmem:[%s3626_s7 + $0x2c] sm:$0x3] %v2272_v17 }
 0x1bf   : > { %v2274_v14 = vld [vmem:[%s3626_s7 + $0x2c] sm:$0xe] }
 0x1c0   : > { %v2275_v12 = vsel %vm4001_vm11, 0, %v2274_v14 }
 0x1c1   : > { %2276 = vst [vmem:[%s3626_s7 + $0x2c] sm:$0xe] %v2275_v12 }
 0x1c2 PF: > { %s14_s17 = sadd.s32 1, %s3094_s17   ;;  %s4242_s15 = smov %s3090_s16 }
 0x1c3   : > { %p11_p5 = scmp.ge.s32.totalorder %s14_s17, 4   ;;  %s4243_s16 = smov %s4245_s18 }
 0x1c5   :  { %13 = sbr.rel (!%p11_p5) target bundleno = 2 (0x2), region = 83 }

</bundles_post_ra>
